<compile_context>
chip_gen: v7x
topology: tpu7x:2x2x1
jax: 0.10.0
libtpu: 0.0.40
codegen_flags: <defaults>
</compile_context>

<pallas_src>
import jax
import jax.numpy as jnp
from jax import lax
from jax.experimental import pallas as pl
from jax.experimental.pallas import tpu as pltpu


# ----------------------------------------------------------------------------- helpers
def _round_up(x, m):
    return ((x + m - 1) // m) * m


def _layernorm(x, g, b, eps=1e-5):
    mu = jnp.mean(x, axis=-1, keepdims=True)
    var = jnp.mean((x - mu) ** 2, axis=-1, keepdims=True)
    return (x - mu) * lax.rsqrt(var + eps) * g + b


def _replicated_spec(arr, *, single_buffer=False):
    """Full-array block, same block for every grid step (weights stay resident)."""
    zeros = (0,) * arr.ndim
    if single_buffer:
        # Resident weights never change per grid step; single-buffer them to halve
        # their VMEM footprint when H/D scale up (matters on v7x: 64 MiB VMEM).
        return pl.BlockSpec(arr.shape, lambda *_, _z=zeros: _z,
                            pipeline_mode=pl.Buffered(1))
    return pl.BlockSpec(arr.shape, lambda *_, _z=zeros: _z)


# ----------------------------------------------------------------------------- fused kernel
def enable_state_kernel(x_ref, wih0_ref, whh0_ref, b0_ref,
                        wih1_ref, whh1_ref, b1_ref,
                        lng_ref, lnb_ref, wfc_ref, bfc_ref,
                        out_ref, xp_ref):
    # x_ref: 2-D (T*bb, D) slab for this batch block, time-major within block.
    TB, _ = x_ref.shape
    H = whh0_ref.shape[0]
    bb = out_ref.shape[0]
    T = TB // bb
    cdt = wih0_ref.dtype                      # MXU operand dtype (bf16 or f32)

    # ---- hoisted layer-0 input projection: ONE matmul for all T timesteps ----
    # Staged through VMEM scratch so the unrolled loop doesn't hold it in vregs.
    xp_ref[...] = (jnp.dot(x_ref[...], wih0_ref[...],
                           preferred_element_type=jnp.float32)
                   + b0_ref[...])

    whh0 = whh0_ref[...]                      # [H, 4H]
    wih1 = wih1_ref[...]                      # [H, 4H]
    whh1 = whh1_ref[...]                      # [H, 4H]
    # Hoisted broadcast (JAX does not CSE broadcast_in_dim inside the loop).
    b1 = jnp.broadcast_to(b1_ref[...], (bb, 4 * H))

    def gates(g):
        # Whole-tile sigmoid / tanh (one EUP pass each), then PyTorch's
        # [i, f, g, o] lane slices along the 4H axis.
        sg = jax.nn.sigmoid(g)
        tg = jnp.tanh(g)
        return (sg[:, 0 * H:1 * H], sg[:, 1 * H:2 * H],
                tg[:, 2 * H:3 * H], sg[:, 3 * H:4 * H])

    def step(t, carry):
        h0, c0, h1, c1 = carry
        start = t * bb
        if not isinstance(start, int):
            start = pl.multiple_of(start, bb)
        xp_t = xp_ref[pl.ds(start, bb), :]

        # Layer-1 hidden matmul depends only on the previous step -> issue its
        # MXU push early so it overlaps the layer-0 gate math.
        g1_hh = jnp.dot(h1.astype(cdt), whh1, preferred_element_type=jnp.float32)

        # Layer 0: only the hidden-state matmul sits on the serial path.
        g0 = xp_t + jnp.dot(h0.astype(cdt), whh0,
                            preferred_element_type=jnp.float32)
        i0, f0, ch0, o0 = gates(g0)
        c0 = f0 * c0 + i0 * ch0
        h0 = o0 * jnp.tanh(c0)

        # Layer 1 (no lane-axis concat): dot(h0, wih1) + dot(h1_prev, whh1) + b1.
        g1 = (jnp.dot(h0.astype(cdt), wih1, preferred_element_type=jnp.float32)
              + g1_hh + b1)
        i1, f1, ch1, o1 = gates(g1)
        c1 = f1 * c1 + i1 * ch1
        h1 = o1 * jnp.tanh(c1)
        return h0, c0, h1, c1

    zeros = jnp.zeros((bb, H), jnp.float32)
    carry = (zeros, zeros, zeros, zeros)
    if T <= 16:
        # Small static trip count -> full unroll (best LLO visibility).
        for t in range(T):
            carry = step(t, carry)
    else:
        # Large T: bound vreg live ranges / compile time with a partial unroll.
        carry = lax.fori_loop(0, T, step, carry, unroll=4)
    h1 = carry[2]

    # h_n[-1] -> LayerNorm -> (Dropout = identity in eval) -> Linear (lane-dense).
    hn = _layernorm(h1, lng_ref[...], lnb_ref[...])
    out_ref[...] = (jnp.dot(hn.astype(cdt), wfc_ref[...],
                            preferred_element_type=jnp.float32) + bfc_ref[...])


# ----------------------------------------------------------------------------- wrapper
def enable_state_forward(x, params, *, batch_block=None,
                         compute_dtype=jnp.bfloat16,
                         single_buffer_weights=False):
    """x: [B, T, input_size] float32 (batch_first).  Returns [B, num_activities]."""
    B, T, D = x.shape
    H = params['whh0'].shape[0]
    A = params['fc_w'].shape[1]

    # ---- batch tiling: big tiles (multiple of 8), >=2 blocks when B allows ----
    Bp8 = _round_up(max(B, 1), 8)
    if batch_block is None:
        bb = min(128, Bp8)
        if bb == Bp8 and Bp8 >= 16:
            # split into two blocks so both v7x TensorCores get work
            bb = _round_up(Bp8 // 2, 8)
    else:
        bb = max(8, min(_round_up(batch_block, 8), Bp8))
    n_blocks = -(-Bp8 // bb)
    Bp = n_blocks * bb

    # ---- wrapper-side layout: block-major, time-major-within-block 2-D slab ----
    xf = x.astype(jnp.float32)
    if Bp != B:
        xf = jnp.pad(xf, ((0, Bp - B), (0, 0), (0, 0)))
    x2d = (xf.reshape(n_blocks, bb, T, D)
              .transpose(0, 2, 1, 3)
              .reshape(n_blocks * T * bb, D)
              .astype(compute_dtype))

    # ---- lane-dense FC output: pad activities up to a multiple of 128 ----------
    Ap = _round_up(A, 128)
    fc_w, fc_b = params['fc_w'], params['fc_b']
    if Ap != A:
        fc_w = jnp.pad(fc_w, ((0, 0), (0, Ap - A)))
        fc_b = jnp.pad(fc_b, ((0, 0), (0, Ap - A)))

    cd = compute_dtype
    weights = (params['wih0'].astype(cd), params['whh0'].astype(cd),
               params['b0'].astype(jnp.float32),
               params['wih1'].astype(cd), params['whh1'].astype(cd),
               params['b1'].astype(jnp.float32),
               params['ln_g'].astype(jnp.float32), params['ln_b'].astype(jnp.float32),
               fc_w.astype(cd), fc_b.astype(jnp.float32))
    w_specs = [_replicated_spec(w, single_buffer=single_buffer_weights)
               for w in weights]

    out = pl.pallas_call(
        enable_state_kernel,
        out_shape=jax.ShapeDtypeStruct((Bp, Ap), jnp.float32),
        grid_spec=pltpu.PrefetchScalarGridSpec(
            num_scalar_prefetch=0,
            grid=(n_blocks,),
            in_specs=[pl.BlockSpec((T * bb, D), lambda b: (b, 0))] + w_specs,
            out_specs=pl.BlockSpec((bb, Ap), lambda b: (b, 0)),
            scratch_shapes=[pltpu.VMEM((T * bb, 4 * H), jnp.float32)],
        ),
        compiler_params=pltpu.CompilerParams(
            dimension_semantics=("parallel",)),
    )(x2d, *weights)

    return out[:B, :A]


# ----------------------------------------------------------------------------- pure-JAX reference
def enable_state_reference(x, params, compute_dtype=jnp.float32):
    B, T, D = x.shape
    H = params['whh0'].shape[0]
    cd = compute_dtype

    def dot(a, w):
        return jnp.dot(a.astype(cd), w.astype(cd),
                       preferred_element_type=jnp.float32)

    def cell(xt, h, c, wih, whh, b):
        g = dot(xt, wih) + dot(h, whh) + b
        i = jax.nn.sigmoid(g[:, :H]); f = jax.nn.sigmoid(g[:, H:2 * H])
        ch = jnp.tanh(g[:, 2 * H:3 * H]); o = jax.nn.sigmoid(g[:, 3 * H:])
        c = f * c + i * ch
        return o * jnp.tanh(c), c

    h0 = c0 = h1 = c1 = jnp.zeros((B, H), jnp.float32)
    xf = x.astype(jnp.float32)
    for t in range(T):
        h0, c0 = cell(xf[:, t], h0, c0, params['wih0'], params['whh0'], params['b0'])
        h1, c1 = cell(h0, h1, c1, params['wih1'], params['whh1'], params['b1'])

    mu = jnp.mean(h1, axis=-1, keepdims=True)
    var = jnp.mean((h1 - mu) ** 2, axis=-1, keepdims=True)
    hn = (h1 - mu) / jnp.sqrt(var + 1e-5) * params['ln_g'] + params['ln_b']
    return dot(hn, params['fc_w']) + params['fc_b']


# ----------------------------------------------------------------------------- params
def init_params(key, input_size, hidden_size, num_activities):
    D, H, A = input_size, hidden_size, num_activities
    keys = iter(jax.random.split(key, 16))

    def nrm(shape, scale=0.1):
        return (scale * jax.random.normal(next(keys), shape)).astype(jnp.float32)

    # Weights pre-transposed to [in, 4H] (PyTorch stores [4H, in]); biases are
    # the combined b_ih + b_hh.  Gate order along 4H is PyTorch's [i, f, g, o].
    return dict(
        wih0=nrm((D, 4 * H)), whh0=nrm((H, 4 * H)), b0=nrm((1, 4 * H)),
        wih1=nrm((H, 4 * H)), whh1=nrm((H, 4 * H)), b1=nrm((1, 4 * H)),
        ln_g=jnp.ones((1, H), jnp.float32),
        ln_b=jnp.zeros((1, H), jnp.float32),
        fc_w=nrm((H, A)), fc_b=nrm((1, A)),
    )


# ----------------------------------------------------------------------------- main
if __name__ == "__main__":
    B, T = 2, 8
    input_size, hidden_size, num_activities = 16, 32, 8

    key = jax.random.PRNGKey(0)
    kp, kx = jax.random.split(key)
    params = init_params(kp, input_size, hidden_size, num_activities)
    x = jax.random.normal(kx, (B, T, input_size), jnp.float32)

    # Exact-semantics check in f32 compute mode.
    out_f32 = enable_state_forward(x, params, compute_dtype=jnp.float32)
    jax.block_until_ready(out_f32)
    ref_f32 = enable_state_reference(x, params, compute_dtype=jnp.float32)
    assert out_f32.shape == (B, num_activities)
    assert bool(jnp.all(jnp.isfinite(out_f32)))
    assert bool(jnp.allclose(out_f32, ref_f32, atol=1e-4, rtol=1e-4)), \
        f"f32 mismatch, max abs err = {float(jnp.max(jnp.abs(out_f32 - ref_f32)))}"

    # Default performance mode: bf16 MXU operands, f32 accumulation.
    out_bf16 = enable_state_forward(x, params)          # compute_dtype=bf16
    jax.block_until_ready(out_bf16)
    ref_bf16 = enable_state_reference(x, params, compute_dtype=jnp.bfloat16)
    assert out_bf16.shape == (B, num_activities)
    assert bool(jnp.all(jnp.isfinite(out_bf16)))
    assert bool(jnp.allclose(out_bf16, ref_bf16, atol=2e-3, rtol=2e-3)), \
        f"bf16 mismatch, max abs err = {float(jnp.max(jnp.abs(out_bf16 - ref_bf16)))}"

    print("KERNEL_OK")
</pallas_src>

<mosaic_0001>
module attributes {stable_mosaic.version = 11 : i64} {
  func.func @enable_state_kernel(%arg0: i32, %arg1: memref<64x16xf32, #tpu.memory_space<vmem>>, %arg2: memref<16x128xf32, #tpu.memory_space<vmem>>, %arg3: memref<32x128xf32, #tpu.memory_space<vmem>>, %arg4: memref<1x128xf32, #tpu.memory_space<vmem>>, %arg5: memref<32x128xf32, #tpu.memory_space<vmem>>, %arg6: memref<32x128xf32, #tpu.memory_space<vmem>>, %arg7: memref<1x128xf32, #tpu.memory_space<vmem>>, %arg8: memref<1x32xf32, #tpu.memory_space<vmem>>, %arg9: memref<1x32xf32, #tpu.memory_space<vmem>>, %arg10: memref<32x128xf32, #tpu.memory_space<vmem>>, %arg11: memref<1x128xf32, #tpu.memory_space<vmem>>, %arg12: memref<8x128xf32, #tpu.memory_space<vmem>>, %arg13: memref<64x128xf32, #tpu.memory_space<vmem>>) attributes {dimension_semantics = [#tpu.dimension_semantics<parallel>], iteration_bounds = array<i64: 1>, scalar_prefetch = 0 : i64, scratch_operands = 1 : i64, tpu.core_type = #tpu.core_type<tc>, window_params = [{transform_indices = @transform_0, window_bounds = array<i64: 64, 16>}, {pipeline_mode = #tpu.pipeline_mode<synchronous>, transform_indices = @transform_1, window_bounds = array<i64: 16, 128>}, {pipeline_mode = #tpu.pipeline_mode<synchronous>, transform_indices = @transform_2, window_bounds = array<i64: 32, 128>}, {pipeline_mode = #tpu.pipeline_mode<synchronous>, transform_indices = @transform_3, window_bounds = array<i64: 1, 128>}, {pipeline_mode = #tpu.pipeline_mode<synchronous>, transform_indices = @transform_4, window_bounds = array<i64: 32, 128>}, {pipeline_mode = #tpu.pipeline_mode<synchronous>, transform_indices = @transform_5, window_bounds = array<i64: 32, 128>}, {pipeline_mode = #tpu.pipeline_mode<synchronous>, transform_indices = @transform_6, window_bounds = array<i64: 1, 128>}, {pipeline_mode = #tpu.pipeline_mode<synchronous>, transform_indices = @transform_7, window_bounds = array<i64: 1, 32>}, {pipeline_mode = #tpu.pipeline_mode<synchronous>, transform_indices = @transform_8, window_bounds = array<i64: 1, 32>}, {pipeline_mode = #tpu.pipeline_mode<synchronous>, transform_indices = @transform_9, window_bounds = array<i64: 32, 128>}, {pipeline_mode = #tpu.pipeline_mode<synchronous>, transform_indices = @transform_10, window_bounds = array<i64: 1, 128>}, {transform_indices = @transform_11, window_bounds = array<i64: 8, 128>}]} {
    %c0 = arith.constant 0 : index
    %c0_0 = arith.constant 0 : index
    %0 = vector.load %arg1[%c0, %c0_0] : memref<64x16xf32, #tpu.memory_space<vmem>>, vector<64x16xf32>
    %c0_1 = arith.constant 0 : index
    %c0_2 = arith.constant 0 : index
    %1 = vector.load %arg2[%c0_1, %c0_2] : memref<16x128xf32, #tpu.memory_space<vmem>>, vector<16x128xf32>
    %cst = arith.constant dense<0.000000e+00> : vector<64x128xf32>
    %2 = tpu.matmul %0, %1, %cst {dimension_numbers = #tpu.dot_dimension_numbers<[1], [0], [0], [1], [0, 0, 1, 1], [], []>} : vector<64x16xf32>, vector<16x128xf32>, vector<64x128xf32> -> vector<64x128xf32>
    %c0_3 = arith.constant 0 : index
    %c0_4 = arith.constant 0 : index
    %3 = vector.load %arg4[%c0_3, %c0_4] : memref<1x128xf32, #tpu.memory_space<vmem>>, vector<1x128xf32>
    %4 = vector.broadcast %3 : vector<1x128xf32> to vector<64x128xf32>
    %5 = arith.addf %2, %4 : vector<64x128xf32>
    %c0_5 = arith.constant 0 : index
    %c0_6 = arith.constant 0 : index
    %6 = vector.load %arg13[%c0_5, %c0_6] : memref<64x128xf32, #tpu.memory_space<vmem>>, vector<64x128xf32>
    tpu.vector_store %arg13[%c0_5, %c0_6], %5 {strides = array<i32>} : memref<64x128xf32, #tpu.memory_space<vmem>>, vector<64x128xf32>,
    %c0_7 = arith.constant 0 : index
    %c0_8 = arith.constant 0 : index
    %7 = vector.load %arg3[%c0_7, %c0_8] : memref<32x128xf32, #tpu.memory_space<vmem>>, vector<32x128xf32>
    %c0_9 = arith.constant 0 : index
    %c0_10 = arith.constant 0 : index
    %8 = vector.load %arg5[%c0_9, %c0_10] : memref<32x128xf32, #tpu.memory_space<vmem>>, vector<32x128xf32>
    %c0_11 = arith.constant 0 : index
    %c0_12 = arith.constant 0 : index
    %9 = vector.load %arg6[%c0_11, %c0_12] : memref<32x128xf32, #tpu.memory_space<vmem>>, vector<32x128xf32>
    %c0_13 = arith.constant 0 : index
    %c0_14 = arith.constant 0 : index
    %10 = vector.load %arg7[%c0_13, %c0_14] : memref<1x128xf32, #tpu.memory_space<vmem>>, vector<1x128xf32>
    %11 = vector.shape_cast %10 : vector<1x128xf32> to vector<1x128xf32>
    %12 = vector.broadcast %11 : vector<1x128xf32> to vector<8x128xf32>
    %cst_15 = arith.constant 0.000000e+00 : f32
    %13 = vector.broadcast %cst_15 : f32 to vector<8x32xf32>
    %c0_16 = arith.constant 0 : index
    %c0_17 = arith.constant 0 : index
    %14 = vector.load %arg13[%c0_16, %c0_17] : memref<64x128xf32, #tpu.memory_space<vmem>>, vector<8x128xf32>
    %cst_18 = arith.constant dense<0.000000e+00> : vector<8x128xf32>
    %15 = tpu.matmul %13, %9, %cst_18 {dimension_numbers = #tpu.dot_dimension_numbers<[1], [0], [0], [1], [0, 0, 1, 1], [], []>} : vector<8x32xf32>, vector<32x128xf32>, vector<8x128xf32> -> vector<8x128xf32>
    %cst_19 = arith.constant dense<0.000000e+00> : vector<8x128xf32>
    %16 = tpu.matmul %13, %7, %cst_19 {dimension_numbers = #tpu.dot_dimension_numbers<[1], [0], [0], [1], [0, 0, 1, 1], [], []>} : vector<8x32xf32>, vector<32x128xf32>, vector<8x128xf32> -> vector<8x128xf32>
    %17 = arith.addf %14, %16 : vector<8x128xf32>
    %18 = arith.negf %17 : vector<8x128xf32>
    %19 = math.exp %18 : vector<8x128xf32>
    %cst_20 = arith.constant 1.000000e+00 : f32
    %20 = vector.broadcast %cst_20 : f32 to vector<8x128xf32>
    %21 = arith.addf %20, %19 : vector<8x128xf32>
    %22 = arith.divf %20, %21 : vector<8x128xf32>
    %23 = math.tanh %17 : vector<8x128xf32>
    %24 = vector.extract_strided_slice %22 {offsets = [0, 0], sizes = [8, 32], strides = [1, 1]} : vector<8x128xf32> to vector<8x32xf32>
    %25 = vector.extract_strided_slice %22 {offsets = [0, 32], sizes = [8, 32], strides = [1, 1]} : vector<8x128xf32> to vector<8x32xf32>
    %26 = vector.extract_strided_slice %23 {offsets = [0, 64], sizes = [8, 32], strides = [1, 1]} : vector<8x128xf32> to vector<8x32xf32>
    %27 = vector.extract_strided_slice %22 {offsets = [0, 96], sizes = [8, 32], strides = [1, 1]} : vector<8x128xf32> to vector<8x32xf32>
    %28 = arith.mulf %25, %13 : vector<8x32xf32>
    %29 = arith.mulf %24, %26 : vector<8x32xf32>
    %30 = arith.addf %28, %29 : vector<8x32xf32>
    %31 = math.tanh %30 : vector<8x32xf32>
    %32 = arith.mulf %27, %31 : vector<8x32xf32>
    %cst_21 = arith.constant dense<0.000000e+00> : vector<8x128xf32>
    %33 = tpu.matmul %32, %8, %cst_21 {dimension_numbers = #tpu.dot_dimension_numbers<[1], [0], [0], [1], [0, 0, 1, 1], [], []>} : vector<8x32xf32>, vector<32x128xf32>, vector<8x128xf32> -> vector<8x128xf32>
    %34 = arith.addf %33, %15 : vector<8x128xf32>
    %35 = arith.addf %34, %12 : vector<8x128xf32>
    %36 = arith.negf %35 : vector<8x128xf32>
    %37 = math.exp %36 : vector<8x128xf32>
    %cst_22 = arith.constant 1.000000e+00 : f32
    %38 = vector.broadcast %cst_22 : f32 to vector<8x128xf32>
    %39 = arith.addf %38, %37 : vector<8x128xf32>
    %40 = arith.divf %38, %39 : vector<8x128xf32>
    %41 = math.tanh %35 : vector<8x128xf32>
    %42 = vector.extract_strided_slice %40 {offsets = [0, 0], sizes = [8, 32], strides = [1, 1]} : vector<8x128xf32> to vector<8x32xf32>
    %43 = vector.extract_strided_slice %40 {offsets = [0, 32], sizes = [8, 32], strides = [1, 1]} : vector<8x128xf32> to vector<8x32xf32>
    %44 = vector.extract_strided_slice %41 {offsets = [0, 64], sizes = [8, 32], strides = [1, 1]} : vector<8x128xf32> to vector<8x32xf32>
    %45 = vector.extract_strided_slice %40 {offsets = [0, 96], sizes = [8, 32], strides = [1, 1]} : vector<8x128xf32> to vector<8x32xf32>
    %46 = arith.mulf %43, %13 : vector<8x32xf32>
    %47 = arith.mulf %42, %44 : vector<8x32xf32>
    %48 = arith.addf %46, %47 : vector<8x32xf32>
    %49 = math.tanh %48 : vector<8x32xf32>
    %50 = arith.mulf %45, %49 : vector<8x32xf32>
    %c8 = arith.constant 8 : index
    %c0_23 = arith.constant 0 : index
    %51 = vector.load %arg13[%c8, %c0_23] : memref<64x128xf32, #tpu.memory_space<vmem>>, vector<8x128xf32>
    %cst_24 = arith.constant dense<0.000000e+00> : vector<8x128xf32>
    %52 = tpu.matmul %50, %9, %cst_24 {dimension_numbers = #tpu.dot_dimension_numbers<[1], [0], [0], [1], [0, 0, 1, 1], [], []>} : vector<8x32xf32>, vector<32x128xf32>, vector<8x128xf32> -> vector<8x128xf32>
    %cst_25 = arith.constant dense<0.000000e+00> : vector<8x128xf32>
    %53 = tpu.matmul %32, %7, %cst_25 {dimension_numbers = #tpu.dot_dimension_numbers<[1], [0], [0], [1], [0, 0, 1, 1], [], []>} : vector<8x32xf32>, vector<32x128xf32>, vector<8x128xf32> -> vector<8x128xf32>
    %54 = arith.addf %51, %53 : vector<8x128xf32>
    %55 = arith.negf %54 : vector<8x128xf32>
    %56 = math.exp %55 : vector<8x128xf32>
    %cst_26 = arith.constant 1.000000e+00 : f32
    %57 = vector.broadcast %cst_26 : f32 to vector<8x128xf32>
    %58 = arith.addf %57, %56 : vector<8x128xf32>
    %59 = arith.divf %57, %58 : vector<8x128xf32>
    %60 = math.tanh %54 : vector<8x128xf32>
    %61 = vector.extract_strided_slice %59 {offsets = [0, 0], sizes = [8, 32], strides = [1, 1]} : vector<8x128xf32> to vector<8x32xf32>
    %62 = vector.extract_strided_slice %59 {offsets = [0, 32], sizes = [8, 32], strides = [1, 1]} : vector<8x128xf32> to vector<8x32xf32>
    %63 = vector.extract_strided_slice %60 {offsets = [0, 64], sizes = [8, 32], strides = [1, 1]} : vector<8x128xf32> to vector<8x32xf32>
    %64 = vector.extract_strided_slice %59 {offsets = [0, 96], sizes = [8, 32], strides = [1, 1]} : vector<8x128xf32> to vector<8x32xf32>
    %65 = arith.mulf %62, %30 : vector<8x32xf32>
    %66 = arith.mulf %61, %63 : vector<8x32xf32>
    %67 = arith.addf %65, %66 : vector<8x32xf32>
    %68 = math.tanh %67 : vector<8x32xf32>
    %69 = arith.mulf %64, %68 : vector<8x32xf32>
    %cst_27 = arith.constant dense<0.000000e+00> : vector<8x128xf32>
    %70 = tpu.matmul %69, %8, %cst_27 {dimension_numbers = #tpu.dot_dimension_numbers<[1], [0], [0], [1], [0, 0, 1, 1], [], []>} : vector<8x32xf32>, vector<32x128xf32>, vector<8x128xf32> -> vector<8x128xf32>
    %71 = arith.addf %70, %52 : vector<8x128xf32>
    %72 = arith.addf %71, %12 : vector<8x128xf32>
    %73 = arith.negf %72 : vector<8x128xf32>
    %74 = math.exp %73 : vector<8x128xf32>
    %cst_28 = arith.constant 1.000000e+00 : f32
    %75 = vector.broadcast %cst_28 : f32 to vector<8x128xf32>
    %76 = arith.addf %75, %74 : vector<8x128xf32>
    %77 = arith.divf %75, %76 : vector<8x128xf32>
    %78 = math.tanh %72 : vector<8x128xf32>
    %79 = vector.extract_strided_slice %77 {offsets = [0, 0], sizes = [8, 32], strides = [1, 1]} : vector<8x128xf32> to vector<8x32xf32>
    %80 = vector.extract_strided_slice %77 {offsets = [0, 32], sizes = [8, 32], strides = [1, 1]} : vector<8x128xf32> to vector<8x32xf32>
    %81 = vector.extract_strided_slice %78 {offsets = [0, 64], sizes = [8, 32], strides = [1, 1]} : vector<8x128xf32> to vector<8x32xf32>
    %82 = vector.extract_strided_slice %77 {offsets = [0, 96], sizes = [8, 32], strides = [1, 1]} : vector<8x128xf32> to vector<8x32xf32>
    %83 = arith.mulf %80, %48 : vector<8x32xf32>
    %84 = arith.mulf %79, %81 : vector<8x32xf32>
    %85 = arith.addf %83, %84 : vector<8x32xf32>
    %86 = math.tanh %85 : vector<8x32xf32>
    %87 = arith.mulf %82, %86 : vector<8x32xf32>
    %c16 = arith.constant 16 : index
    %c0_29 = arith.constant 0 : index
    %88 = vector.load %arg13[%c16, %c0_29] : memref<64x128xf32, #tpu.memory_space<vmem>>, vector<8x128xf32>
    %cst_30 = arith.constant dense<0.000000e+00> : vector<8x128xf32>
    %89 = tpu.matmul %87, %9, %cst_30 {dimension_numbers = #tpu.dot_dimension_numbers<[1], [0], [0], [1], [0, 0, 1, 1], [], []>} : vector<8x32xf32>, vector<32x128xf32>, vector<8x128xf32> -> vector<8x128xf32>
    %cst_31 = arith.constant dense<0.000000e+00> : vector<8x128xf32>
    %90 = tpu.matmul %69, %7, %cst_31 {dimension_numbers = #tpu.dot_dimension_numbers<[1], [0], [0], [1], [0, 0, 1, 1], [], []>} : vector<8x32xf32>, vector<32x128xf32>, vector<8x128xf32> -> vector<8x128xf32>
    %91 = arith.addf %88, %90 : vector<8x128xf32>
    %92 = arith.negf %91 : vector<8x128xf32>
    %93 = math.exp %92 : vector<8x128xf32>
    %cst_32 = arith.constant 1.000000e+00 : f32
    %94 = vector.broadcast %cst_32 : f32 to vector<8x128xf32>
    %95 = arith.addf %94, %93 : vector<8x128xf32>
    %96 = arith.divf %94, %95 : vector<8x128xf32>
    %97 = math.tanh %91 : vector<8x128xf32>
    %98 = vector.extract_strided_slice %96 {offsets = [0, 0], sizes = [8, 32], strides = [1, 1]} : vector<8x128xf32> to vector<8x32xf32>
    %99 = vector.extract_strided_slice %96 {offsets = [0, 32], sizes = [8, 32], strides = [1, 1]} : vector<8x128xf32> to vector<8x32xf32>
    %100 = vector.extract_strided_slice %97 {offsets = [0, 64], sizes = [8, 32], strides = [1, 1]} : vector<8x128xf32> to vector<8x32xf32>
    %101 = vector.extract_strided_slice %96 {offsets = [0, 96], sizes = [8, 32], strides = [1, 1]} : vector<8x128xf32> to vector<8x32xf32>
    %102 = arith.mulf %99, %67 : vector<8x32xf32>
    %103 = arith.mulf %98, %100 : vector<8x32xf32>
    %104 = arith.addf %102, %103 : vector<8x32xf32>
    %105 = math.tanh %104 : vector<8x32xf32>
    %106 = arith.mulf %101, %105 : vector<8x32xf32>
    %cst_33 = arith.constant dense<0.000000e+00> : vector<8x128xf32>
    %107 = tpu.matmul %106, %8, %cst_33 {dimension_numbers = #tpu.dot_dimension_numbers<[1], [0], [0], [1], [0, 0, 1, 1], [], []>} : vector<8x32xf32>, vector<32x128xf32>, vector<8x128xf32> -> vector<8x128xf32>
    %108 = arith.addf %107, %89 : vector<8x128xf32>
    %109 = arith.addf %108, %12 : vector<8x128xf32>
    %110 = arith.negf %109 : vector<8x128xf32>
    %111 = math.exp %110 : vector<8x128xf32>
    %cst_34 = arith.constant 1.000000e+00 : f32
    %112 = vector.broadcast %cst_34 : f32 to vector<8x128xf32>
    %113 = arith.addf %112, %111 : vector<8x128xf32>
    %114 = arith.divf %112, %113 : vector<8x128xf32>
    %115 = math.tanh %109 : vector<8x128xf32>
    %116 = vector.extract_strided_slice %114 {offsets = [0, 0], sizes = [8, 32], strides = [1, 1]} : vector<8x128xf32> to vector<8x32xf32>
    %117 = vector.extract_strided_slice %114 {offsets = [0, 32], sizes = [8, 32], strides = [1, 1]} : vector<8x128xf32> to vector<8x32xf32>
    %118 = vector.extract_strided_slice %115 {offsets = [0, 64], sizes = [8, 32], strides = [1, 1]} : vector<8x128xf32> to vector<8x32xf32>
    %119 = vector.extract_strided_slice %114 {offsets = [0, 96], sizes = [8, 32], strides = [1, 1]} : vector<8x128xf32> to vector<8x32xf32>
    %120 = arith.mulf %117, %85 : vector<8x32xf32>
    %121 = arith.mulf %116, %118 : vector<8x32xf32>
    %122 = arith.addf %120, %121 : vector<8x32xf32>
    %123 = math.tanh %122 : vector<8x32xf32>
    %124 = arith.mulf %119, %123 : vector<8x32xf32>
    %c24 = arith.constant 24 : index
    %c0_35 = arith.constant 0 : index
    %125 = vector.load %arg13[%c24, %c0_35] : memref<64x128xf32, #tpu.memory_space<vmem>>, vector<8x128xf32>
    %cst_36 = arith.constant dense<0.000000e+00> : vector<8x128xf32>
    %126 = tpu.matmul %124, %9, %cst_36 {dimension_numbers = #tpu.dot_dimension_numbers<[1], [0], [0], [1], [0, 0, 1, 1], [], []>} : vector<8x32xf32>, vector<32x128xf32>, vector<8x128xf32> -> vector<8x128xf32>
    %cst_37 = arith.constant dense<0.000000e+00> : vector<8x128xf32>
    %127 = tpu.matmul %106, %7, %cst_37 {dimension_numbers = #tpu.dot_dimension_numbers<[1], [0], [0], [1], [0, 0, 1, 1], [], []>} : vector<8x32xf32>, vector<32x128xf32>, vector<8x128xf32> -> vector<8x128xf32>
    %128 = arith.addf %125, %127 : vector<8x128xf32>
    %129 = arith.negf %128 : vector<8x128xf32>
    %130 = math.exp %129 : vector<8x128xf32>
    %cst_38 = arith.constant 1.000000e+00 : f32
    %131 = vector.broadcast %cst_38 : f32 to vector<8x128xf32>
    %132 = arith.addf %131, %130 : vector<8x128xf32>
    %133 = arith.divf %131, %132 : vector<8x128xf32>
    %134 = math.tanh %128 : vector<8x128xf32>
    %135 = vector.extract_strided_slice %133 {offsets = [0, 0], sizes = [8, 32], strides = [1, 1]} : vector<8x128xf32> to vector<8x32xf32>
    %136 = vector.extract_strided_slice %133 {offsets = [0, 32], sizes = [8, 32], strides = [1, 1]} : vector<8x128xf32> to vector<8x32xf32>
    %137 = vector.extract_strided_slice %134 {offsets = [0, 64], sizes = [8, 32], strides = [1, 1]} : vector<8x128xf32> to vector<8x32xf32>
    %138 = vector.extract_strided_slice %133 {offsets = [0, 96], sizes = [8, 32], strides = [1, 1]} : vector<8x128xf32> to vector<8x32xf32>
    %139 = arith.mulf %136, %104 : vector<8x32xf32>
    %140 = arith.mulf %135, %137 : vector<8x32xf32>
    %141 = arith.addf %139, %140 : vector<8x32xf32>
    %142 = math.tanh %141 : vector<8x32xf32>
    %143 = arith.mulf %138, %142 : vector<8x32xf32>
    %cst_39 = arith.constant dense<0.000000e+00> : vector<8x128xf32>
    %144 = tpu.matmul %143, %8, %cst_39 {dimension_numbers = #tpu.dot_dimension_numbers<[1], [0], [0], [1], [0, 0, 1, 1], [], []>} : vector<8x32xf32>, vector<32x128xf32>, vector<8x128xf32> -> vector<8x128xf32>
    %145 = arith.addf %144, %126 : vector<8x128xf32>
    %146 = arith.addf %145, %12 : vector<8x128xf32>
    %147 = arith.negf %146 : vector<8x128xf32>
    %148 = math.exp %147 : vector<8x128xf32>
    %cst_40 = arith.constant 1.000000e+00 : f32
    %149 = vector.broadcast %cst_40 : f32 to vector<8x128xf32>
    %150 = arith.addf %149, %148 : vector<8x128xf32>
    %151 = arith.divf %149, %150 : vector<8x128xf32>
    %152 = math.tanh %146 : vector<8x128xf32>
    %153 = vector.extract_strided_slice %151 {offsets = [0, 0], sizes = [8, 32], strides = [1, 1]} : vector<8x128xf32> to vector<8x32xf32>
    %154 = vector.extract_strided_slice %151 {offsets = [0, 32], sizes = [8, 32], strides = [1, 1]} : vector<8x128xf32> to vector<8x32xf32>
    %155 = vector.extract_strided_slice %152 {offsets = [0, 64], sizes = [8, 32], strides = [1, 1]} : vector<8x128xf32> to vector<8x32xf32>
    %156 = vector.extract_strided_slice %151 {offsets = [0, 96], sizes = [8, 32], strides = [1, 1]} : vector<8x128xf32> to vector<8x32xf32>
    %157 = arith.mulf %154, %122 : vector<8x32xf32>
    %158 = arith.mulf %153, %155 : vector<8x32xf32>
    %159 = arith.addf %157, %158 : vector<8x32xf32>
    %160 = math.tanh %159 : vector<8x32xf32>
    %161 = arith.mulf %156, %160 : vector<8x32xf32>
    %c32 = arith.constant 32 : index
    %c0_41 = arith.constant 0 : index
    %162 = vector.load %arg13[%c32, %c0_41] : memref<64x128xf32, #tpu.memory_space<vmem>>, vector<8x128xf32>
    %cst_42 = arith.constant dense<0.000000e+00> : vector<8x128xf32>
    %163 = tpu.matmul %161, %9, %cst_42 {dimension_numbers = #tpu.dot_dimension_numbers<[1], [0], [0], [1], [0, 0, 1, 1], [], []>} : vector<8x32xf32>, vector<32x128xf32>, vector<8x128xf32> -> vector<8x128xf32>
    %cst_43 = arith.constant dense<0.000000e+00> : vector<8x128xf32>
    %164 = tpu.matmul %143, %7, %cst_43 {dimension_numbers = #tpu.dot_dimension_numbers<[1], [0], [0], [1], [0, 0, 1, 1], [], []>} : vector<8x32xf32>, vector<32x128xf32>, vector<8x128xf32> -> vector<8x128xf32>
    %165 = arith.addf %162, %164 : vector<8x128xf32>
    %166 = arith.negf %165 : vector<8x128xf32>
    %167 = math.exp %166 : vector<8x128xf32>
    %cst_44 = arith.constant 1.000000e+00 : f32
    %168 = vector.broadcast %cst_44 : f32 to vector<8x128xf32>
    %169 = arith.addf %168, %167 : vector<8x128xf32>
    %170 = arith.divf %168, %169 : vector<8x128xf32>
    %171 = math.tanh %165 : vector<8x128xf32>
    %172 = vector.extract_strided_slice %170 {offsets = [0, 0], sizes = [8, 32], strides = [1, 1]} : vector<8x128xf32> to vector<8x32xf32>
    %173 = vector.extract_strided_slice %170 {offsets = [0, 32], sizes = [8, 32], strides = [1, 1]} : vector<8x128xf32> to vector<8x32xf32>
    %174 = vector.extract_strided_slice %171 {offsets = [0, 64], sizes = [8, 32], strides = [1, 1]} : vector<8x128xf32> to vector<8x32xf32>
    %175 = vector.extract_strided_slice %170 {offsets = [0, 96], sizes = [8, 32], strides = [1, 1]} : vector<8x128xf32> to vector<8x32xf32>
    %176 = arith.mulf %173, %141 : vector<8x32xf32>
    %177 = arith.mulf %172, %174 : vector<8x32xf32>
    %178 = arith.addf %176, %177 : vector<8x32xf32>
    %179 = math.tanh %178 : vector<8x32xf32>
    %180 = arith.mulf %175, %179 : vector<8x32xf32>
    %cst_45 = arith.constant dense<0.000000e+00> : vector<8x128xf32>
    %181 = tpu.matmul %180, %8, %cst_45 {dimension_numbers = #tpu.dot_dimension_numbers<[1], [0], [0], [1], [0, 0, 1, 1], [], []>} : vector<8x32xf32>, vector<32x128xf32>, vector<8x128xf32> -> vector<8x128xf32>
    %182 = arith.addf %181, %163 : vector<8x128xf32>
    %183 = arith.addf %182, %12 : vector<8x128xf32>
    %184 = arith.negf %183 : vector<8x128xf32>
    %185 = math.exp %184 : vector<8x128xf32>
    %cst_46 = arith.constant 1.000000e+00 : f32
    %186 = vector.broadcast %cst_46 : f32 to vector<8x128xf32>
    %187 = arith.addf %186, %185 : vector<8x128xf32>
    %188 = arith.divf %186, %187 : vector<8x128xf32>
    %189 = math.tanh %183 : vector<8x128xf32>
    %190 = vector.extract_strided_slice %188 {offsets = [0, 0], sizes = [8, 32], strides = [1, 1]} : vector<8x128xf32> to vector<8x32xf32>
    %191 = vector.extract_strided_slice %188 {offsets = [0, 32], sizes = [8, 32], strides = [1, 1]} : vector<8x128xf32> to vector<8x32xf32>
    %192 = vector.extract_strided_slice %189 {offsets = [0, 64], sizes = [8, 32], strides = [1, 1]} : vector<8x128xf32> to vector<8x32xf32>
    %193 = vector.extract_strided_slice %188 {offsets = [0, 96], sizes = [8, 32], strides = [1, 1]} : vector<8x128xf32> to vector<8x32xf32>
    %194 = arith.mulf %191, %159 : vector<8x32xf32>
    %195 = arith.mulf %190, %192 : vector<8x32xf32>
    %196 = arith.addf %194, %195 : vector<8x32xf32>
    %197 = math.tanh %196 : vector<8x32xf32>
    %198 = arith.mulf %193, %197 : vector<8x32xf32>
    %c40 = arith.constant 40 : index
    %c0_47 = arith.constant 0 : index
    %199 = vector.load %arg13[%c40, %c0_47] : memref<64x128xf32, #tpu.memory_space<vmem>>, vector<8x128xf32>
    %cst_48 = arith.constant dense<0.000000e+00> : vector<8x128xf32>
    %200 = tpu.matmul %198, %9, %cst_48 {dimension_numbers = #tpu.dot_dimension_numbers<[1], [0], [0], [1], [0, 0, 1, 1], [], []>} : vector<8x32xf32>, vector<32x128xf32>, vector<8x128xf32> -> vector<8x128xf32>
    %cst_49 = arith.constant dense<0.000000e+00> : vector<8x128xf32>
    %201 = tpu.matmul %180, %7, %cst_49 {dimension_numbers = #tpu.dot_dimension_numbers<[1], [0], [0], [1], [0, 0, 1, 1], [], []>} : vector<8x32xf32>, vector<32x128xf32>, vector<8x128xf32> -> vector<8x128xf32>
    %202 = arith.addf %199, %201 : vector<8x128xf32>
    %203 = arith.negf %202 : vector<8x128xf32>
    %204 = math.exp %203 : vector<8x128xf32>
    %cst_50 = arith.constant 1.000000e+00 : f32
    %205 = vector.broadcast %cst_50 : f32 to vector<8x128xf32>
    %206 = arith.addf %205, %204 : vector<8x128xf32>
    %207 = arith.divf %205, %206 : vector<8x128xf32>
    %208 = math.tanh %202 : vector<8x128xf32>
    %209 = vector.extract_strided_slice %207 {offsets = [0, 0], sizes = [8, 32], strides = [1, 1]} : vector<8x128xf32> to vector<8x32xf32>
    %210 = vector.extract_strided_slice %207 {offsets = [0, 32], sizes = [8, 32], strides = [1, 1]} : vector<8x128xf32> to vector<8x32xf32>
    %211 = vector.extract_strided_slice %208 {offsets = [0, 64], sizes = [8, 32], strides = [1, 1]} : vector<8x128xf32> to vector<8x32xf32>
    %212 = vector.extract_strided_slice %207 {offsets = [0, 96], sizes = [8, 32], strides = [1, 1]} : vector<8x128xf32> to vector<8x32xf32>
    %213 = arith.mulf %210, %178 : vector<8x32xf32>
    %214 = arith.mulf %209, %211 : vector<8x32xf32>
    %215 = arith.addf %213, %214 : vector<8x32xf32>
    %216 = math.tanh %215 : vector<8x32xf32>
    %217 = arith.mulf %212, %216 : vector<8x32xf32>
    %cst_51 = arith.constant dense<0.000000e+00> : vector<8x128xf32>
    %218 = tpu.matmul %217, %8, %cst_51 {dimension_numbers = #tpu.dot_dimension_numbers<[1], [0], [0], [1], [0, 0, 1, 1], [], []>} : vector<8x32xf32>, vector<32x128xf32>, vector<8x128xf32> -> vector<8x128xf32>
    %219 = arith.addf %218, %200 : vector<8x128xf32>
    %220 = arith.addf %219, %12 : vector<8x128xf32>
    %221 = arith.negf %220 : vector<8x128xf32>
    %222 = math.exp %221 : vector<8x128xf32>
    %cst_52 = arith.constant 1.000000e+00 : f32
    %223 = vector.broadcast %cst_52 : f32 to vector<8x128xf32>
    %224 = arith.addf %223, %222 : vector<8x128xf32>
    %225 = arith.divf %223, %224 : vector<8x128xf32>
    %226 = math.tanh %220 : vector<8x128xf32>
    %227 = vector.extract_strided_slice %225 {offsets = [0, 0], sizes = [8, 32], strides = [1, 1]} : vector<8x128xf32> to vector<8x32xf32>
    %228 = vector.extract_strided_slice %225 {offsets = [0, 32], sizes = [8, 32], strides = [1, 1]} : vector<8x128xf32> to vector<8x32xf32>
    %229 = vector.extract_strided_slice %226 {offsets = [0, 64], sizes = [8, 32], strides = [1, 1]} : vector<8x128xf32> to vector<8x32xf32>
    %230 = vector.extract_strided_slice %225 {offsets = [0, 96], sizes = [8, 32], strides = [1, 1]} : vector<8x128xf32> to vector<8x32xf32>
    %231 = arith.mulf %228, %196 : vector<8x32xf32>
    %232 = arith.mulf %227, %229 : vector<8x32xf32>
    %233 = arith.addf %231, %232 : vector<8x32xf32>
    %234 = math.tanh %233 : vector<8x32xf32>
    %235 = arith.mulf %230, %234 : vector<8x32xf32>
    %c48 = arith.constant 48 : index
    %c0_53 = arith.constant 0 : index
    %236 = vector.load %arg13[%c48, %c0_53] : memref<64x128xf32, #tpu.memory_space<vmem>>, vector<8x128xf32>
    %cst_54 = arith.constant dense<0.000000e+00> : vector<8x128xf32>
    %237 = tpu.matmul %235, %9, %cst_54 {dimension_numbers = #tpu.dot_dimension_numbers<[1], [0], [0], [1], [0, 0, 1, 1], [], []>} : vector<8x32xf32>, vector<32x128xf32>, vector<8x128xf32> -> vector<8x128xf32>
    %cst_55 = arith.constant dense<0.000000e+00> : vector<8x128xf32>
    %238 = tpu.matmul %217, %7, %cst_55 {dimension_numbers = #tpu.dot_dimension_numbers<[1], [0], [0], [1], [0, 0, 1, 1], [], []>} : vector<8x32xf32>, vector<32x128xf32>, vector<8x128xf32> -> vector<8x128xf32>
    %239 = arith.addf %236, %238 : vector<8x128xf32>
    %240 = arith.negf %239 : vector<8x128xf32>
    %241 = math.exp %240 : vector<8x128xf32>
    %cst_56 = arith.constant 1.000000e+00 : f32
    %242 = vector.broadcast %cst_56 : f32 to vector<8x128xf32>
    %243 = arith.addf %242, %241 : vector<8x128xf32>
    %244 = arith.divf %242, %243 : vector<8x128xf32>
    %245 = math.tanh %239 : vector<8x128xf32>
    %246 = vector.extract_strided_slice %244 {offsets = [0, 0], sizes = [8, 32], strides = [1, 1]} : vector<8x128xf32> to vector<8x32xf32>
    %247 = vector.extract_strided_slice %244 {offsets = [0, 32], sizes = [8, 32], strides = [1, 1]} : vector<8x128xf32> to vector<8x32xf32>
    %248 = vector.extract_strided_slice %245 {offsets = [0, 64], sizes = [8, 32], strides = [1, 1]} : vector<8x128xf32> to vector<8x32xf32>
    %249 = vector.extract_strided_slice %244 {offsets = [0, 96], sizes = [8, 32], strides = [1, 1]} : vector<8x128xf32> to vector<8x32xf32>
    %250 = arith.mulf %247, %215 : vector<8x32xf32>
    %251 = arith.mulf %246, %248 : vector<8x32xf32>
    %252 = arith.addf %250, %251 : vector<8x32xf32>
    %253 = math.tanh %252 : vector<8x32xf32>
    %254 = arith.mulf %249, %253 : vector<8x32xf32>
    %cst_57 = arith.constant dense<0.000000e+00> : vector<8x128xf32>
    %255 = tpu.matmul %254, %8, %cst_57 {dimension_numbers = #tpu.dot_dimension_numbers<[1], [0], [0], [1], [0, 0, 1, 1], [], []>} : vector<8x32xf32>, vector<32x128xf32>, vector<8x128xf32> -> vector<8x128xf32>
    %256 = arith.addf %255, %237 : vector<8x128xf32>
    %257 = arith.addf %256, %12 : vector<8x128xf32>
    %258 = arith.negf %257 : vector<8x128xf32>
    %259 = math.exp %258 : vector<8x128xf32>
    %cst_58 = arith.constant 1.000000e+00 : f32
    %260 = vector.broadcast %cst_58 : f32 to vector<8x128xf32>
    %261 = arith.addf %260, %259 : vector<8x128xf32>
    %262 = arith.divf %260, %261 : vector<8x128xf32>
    %263 = math.tanh %257 : vector<8x128xf32>
    %264 = vector.extract_strided_slice %262 {offsets = [0, 0], sizes = [8, 32], strides = [1, 1]} : vector<8x128xf32> to vector<8x32xf32>
    %265 = vector.extract_strided_slice %262 {offsets = [0, 32], sizes = [8, 32], strides = [1, 1]} : vector<8x128xf32> to vector<8x32xf32>
    %266 = vector.extract_strided_slice %263 {offsets = [0, 64], sizes = [8, 32], strides = [1, 1]} : vector<8x128xf32> to vector<8x32xf32>
    %267 = vector.extract_strided_slice %262 {offsets = [0, 96], sizes = [8, 32], strides = [1, 1]} : vector<8x128xf32> to vector<8x32xf32>
    %268 = arith.mulf %265, %233 : vector<8x32xf32>
    %269 = arith.mulf %264, %266 : vector<8x32xf32>
    %270 = arith.addf %268, %269 : vector<8x32xf32>
    %271 = math.tanh %270 : vector<8x32xf32>
    %272 = arith.mulf %267, %271 : vector<8x32xf32>
    %c56 = arith.constant 56 : index
    %c0_59 = arith.constant 0 : index
    %273 = vector.load %arg13[%c56, %c0_59] : memref<64x128xf32, #tpu.memory_space<vmem>>, vector<8x128xf32>
    %cst_60 = arith.constant dense<0.000000e+00> : vector<8x128xf32>
    %274 = tpu.matmul %272, %9, %cst_60 {dimension_numbers = #tpu.dot_dimension_numbers<[1], [0], [0], [1], [0, 0, 1, 1], [], []>} : vector<8x32xf32>, vector<32x128xf32>, vector<8x128xf32> -> vector<8x128xf32>
    %cst_61 = arith.constant dense<0.000000e+00> : vector<8x128xf32>
    %275 = tpu.matmul %254, %7, %cst_61 {dimension_numbers = #tpu.dot_dimension_numbers<[1], [0], [0], [1], [0, 0, 1, 1], [], []>} : vector<8x32xf32>, vector<32x128xf32>, vector<8x128xf32> -> vector<8x128xf32>
    %276 = arith.addf %273, %275 : vector<8x128xf32>
    %277 = arith.negf %276 : vector<8x128xf32>
    %278 = math.exp %277 : vector<8x128xf32>
    %cst_62 = arith.constant 1.000000e+00 : f32
    %279 = vector.broadcast %cst_62 : f32 to vector<8x128xf32>
    %280 = arith.addf %279, %278 : vector<8x128xf32>
    %281 = arith.divf %279, %280 : vector<8x128xf32>
    %282 = math.tanh %276 : vector<8x128xf32>
    %283 = vector.extract_strided_slice %281 {offsets = [0, 0], sizes = [8, 32], strides = [1, 1]} : vector<8x128xf32> to vector<8x32xf32>
    %284 = vector.extract_strided_slice %281 {offsets = [0, 32], sizes = [8, 32], strides = [1, 1]} : vector<8x128xf32> to vector<8x32xf32>
    %285 = vector.extract_strided_slice %282 {offsets = [0, 64], sizes = [8, 32], strides = [1, 1]} : vector<8x128xf32> to vector<8x32xf32>
    %286 = vector.extract_strided_slice %281 {offsets = [0, 96], sizes = [8, 32], strides = [1, 1]} : vector<8x128xf32> to vector<8x32xf32>
    %287 = arith.mulf %284, %252 : vector<8x32xf32>
    %288 = arith.mulf %283, %285 : vector<8x32xf32>
    %289 = arith.addf %287, %288 : vector<8x32xf32>
    %290 = math.tanh %289 : vector<8x32xf32>
    %291 = arith.mulf %286, %290 : vector<8x32xf32>
    %cst_63 = arith.constant dense<0.000000e+00> : vector<8x128xf32>
    %292 = tpu.matmul %291, %8, %cst_63 {dimension_numbers = #tpu.dot_dimension_numbers<[1], [0], [0], [1], [0, 0, 1, 1], [], []>} : vector<8x32xf32>, vector<32x128xf32>, vector<8x128xf32> -> vector<8x128xf32>
    %293 = arith.addf %292, %274 : vector<8x128xf32>
    %294 = arith.addf %293, %12 : vector<8x128xf32>
    %295 = arith.negf %294 : vector<8x128xf32>
    %296 = math.exp %295 : vector<8x128xf32>
    %cst_64 = arith.constant 1.000000e+00 : f32
    %297 = vector.broadcast %cst_64 : f32 to vector<8x128xf32>
    %298 = arith.addf %297, %296 : vector<8x128xf32>
    %299 = arith.divf %297, %298 : vector<8x128xf32>
    %300 = math.tanh %294 : vector<8x128xf32>
    %301 = vector.extract_strided_slice %299 {offsets = [0, 0], sizes = [8, 32], strides = [1, 1]} : vector<8x128xf32> to vector<8x32xf32>
    %302 = vector.extract_strided_slice %299 {offsets = [0, 32], sizes = [8, 32], strides = [1, 1]} : vector<8x128xf32> to vector<8x32xf32>
    %303 = vector.extract_strided_slice %300 {offsets = [0, 64], sizes = [8, 32], strides = [1, 1]} : vector<8x128xf32> to vector<8x32xf32>
    %304 = vector.extract_strided_slice %299 {offsets = [0, 96], sizes = [8, 32], strides = [1, 1]} : vector<8x128xf32> to vector<8x32xf32>
    %305 = arith.mulf %302, %270 : vector<8x32xf32>
    %306 = arith.mulf %301, %303 : vector<8x32xf32>
    %307 = arith.addf %305, %306 : vector<8x32xf32>
    %308 = math.tanh %307 : vector<8x32xf32>
    %309 = arith.mulf %304, %308 : vector<8x32xf32>
    %c0_65 = arith.constant 0 : index
    %c0_66 = arith.constant 0 : index
    %310 = vector.load %arg8[%c0_65, %c0_66] : memref<1x32xf32, #tpu.memory_space<vmem>>, vector<1x32xf32>
    %c0_67 = arith.constant 0 : index
    %c0_68 = arith.constant 0 : index
    %311 = vector.load %arg9[%c0_67, %c0_68] : memref<1x32xf32, #tpu.memory_space<vmem>>, vector<1x32xf32>
    %cst_69 = arith.constant dense<0.000000e+00> : vector<8xf32>
    %312 = vector.multi_reduction <add>, %309, %cst_69 [1] : vector<8x32xf32> to vector<8xf32>
    %313 = vector.shape_cast %312 : vector<8xf32> to vector<8x1xf32>
    %cst_70 = arith.constant 3.200000e+01 : f32
    %314 = vector.broadcast %cst_70 : f32 to vector<8x1xf32>
    %315 = arith.divf %313, %314 : vector<8x1xf32>
    %316 = vector.broadcast %315 : vector<8x1xf32> to vector<8x32xf32>
    %317 = arith.subf %309, %316 : vector<8x32xf32>
    %318 = arith.mulf %317, %317 : vector<8x32xf32>
    %cst_71 = arith.constant dense<0.000000e+00> : vector<8xf32>
    %319 = vector.multi_reduction <add>, %318, %cst_71 [1] : vector<8x32xf32> to vector<8xf32>
    %320 = vector.shape_cast %319 : vector<8xf32> to vector<8x1xf32>
    %cst_72 = arith.constant 3.200000e+01 : f32
    %321 = vector.broadcast %cst_72 : f32 to vector<8x1xf32>
    %322 = arith.divf %320, %321 : vector<8x1xf32>
    %323 = vector.broadcast %315 : vector<8x1xf32> to vector<8x32xf32>
    %324 = arith.subf %309, %323 : vector<8x32xf32>
    %cst_73 = arith.constant 9.99999974E-6 : f32
    %325 = vector.broadcast %cst_73 : f32 to vector<8x1xf32>
    %326 = arith.addf %322, %325 : vector<8x1xf32>
    %327 = math.rsqrt %326 : vector<8x1xf32>
    %328 = vector.broadcast %327 : vector<8x1xf32> to vector<8x32xf32>
    %329 = arith.mulf %324, %328 : vector<8x32xf32>
    %330 = vector.broadcast %310 : vector<1x32xf32> to vector<8x32xf32>
    %331 = arith.mulf %329, %330 : vector<8x32xf32>
    %332 = vector.broadcast %311 : vector<1x32xf32> to vector<8x32xf32>
    %333 = arith.addf %331, %332 : vector<8x32xf32>
    %c0_74 = arith.constant 0 : index
    %c0_75 = arith.constant 0 : index
    %334 = vector.load %arg10[%c0_74, %c0_75] : memref<32x128xf32, #tpu.memory_space<vmem>>, vector<32x128xf32>
    %cst_76 = arith.constant dense<0.000000e+00> : vector<8x128xf32>
    %335 = tpu.matmul %333, %334, %cst_76 {dimension_numbers = #tpu.dot_dimension_numbers<[1], [0], [0], [1], [0, 0, 1, 1], [], []>} : vector<8x32xf32>, vector<32x128xf32>, vector<8x128xf32> -> vector<8x128xf32>
    %c0_77 = arith.constant 0 : index
    %c0_78 = arith.constant 0 : index
    %336 = vector.load %arg11[%c0_77, %c0_78] : memref<1x128xf32, #tpu.memory_space<vmem>>, vector<1x128xf32>
    %337 = vector.broadcast %336 : vector<1x128xf32> to vector<8x128xf32>
    %338 = arith.addf %335, %337 : vector<8x128xf32>
    %c0_79 = arith.constant 0 : index
    %c0_80 = arith.constant 0 : index
    %339 = vector.load %arg12[%c0_79, %c0_80] : memref<8x128xf32, #tpu.memory_space<vmem>>, vector<8x128xf32>
    tpu.vector_store %arg12[%c0_79, %c0_80], %338 {strides = array<i32>} : memref<8x128xf32, #tpu.memory_space<vmem>>, vector<8x128xf32>,
    return
  }
  func.func @transform_0(%arg0: i32) -> (i32, i32) {
    %c0_i32 = arith.constant 0 : i32
    %c0_i32_0 = arith.constant 0 : i32
    return %arg0, %c0_i32 : i32, i32
  }
  func.func @transform_1(%arg0: i32) -> (i32, i32) {
    %c0_i32 = arith.constant 0 : i32
    %c0_i32_0 = arith.constant 0 : i32
    %c0_i32_1 = arith.constant 0 : i32
    return %c0_i32, %c0_i32_0 : i32, i32
  }
  func.func @transform_2(%arg0: i32) -> (i32, i32) {
    %c0_i32 = arith.constant 0 : i32
    %c0_i32_0 = arith.constant 0 : i32
    %c0_i32_1 = arith.constant 0 : i32
    return %c0_i32, %c0_i32_0 : i32, i32
  }
  func.func @transform_3(%arg0: i32) -> (i32, i32) {
    %c0_i32 = arith.constant 0 : i32
    %c0_i32_0 = arith.constant 0 : i32
    %c0_i32_1 = arith.constant 0 : i32
    return %c0_i32, %c0_i32_0 : i32, i32
  }
  func.func @transform_4(%arg0: i32) -> (i32, i32) {
    %c0_i32 = arith.constant 0 : i32
    %c0_i32_0 = arith.constant 0 : i32
    %c0_i32_1 = arith.constant 0 : i32
    return %c0_i32, %c0_i32_0 : i32, i32
  }
  func.func @transform_5(%arg0: i32) -> (i32, i32) {
    %c0_i32 = arith.constant 0 : i32
    %c0_i32_0 = arith.constant 0 : i32
    %c0_i32_1 = arith.constant 0 : i32
    return %c0_i32, %c0_i32_0 : i32, i32
  }
  func.func @transform_6(%arg0: i32) -> (i32, i32) {
    %c0_i32 = arith.constant 0 : i32
    %c0_i32_0 = arith.constant 0 : i32
    %c0_i32_1 = arith.constant 0 : i32
    return %c0_i32, %c0_i32_0 : i32, i32
  }
  func.func @transform_7(%arg0: i32) -> (i32, i32) {
    %c0_i32 = arith.constant 0 : i32
    %c0_i32_0 = arith.constant 0 : i32
    %c0_i32_1 = arith.constant 0 : i32
    return %c0_i32, %c0_i32_0 : i32, i32
  }
  func.func @transform_8(%arg0: i32) -> (i32, i32) {
    %c0_i32 = arith.constant 0 : i32
    %c0_i32_0 = arith.constant 0 : i32
    %c0_i32_1 = arith.constant 0 : i32
    return %c0_i32, %c0_i32_0 : i32, i32
  }
  func.func @transform_9(%arg0: i32) -> (i32, i32) {
    %c0_i32 = arith.constant 0 : i32
    %c0_i32_0 = arith.constant 0 : i32
    %c0_i32_1 = arith.constant 0 : i32
    return %c0_i32, %c0_i32_0 : i32, i32
  }
  func.func @transform_10(%arg0: i32) -> (i32, i32) {
    %c0_i32 = arith.constant 0 : i32
    %c0_i32_0 = arith.constant 0 : i32
    %c0_i32_1 = arith.constant 0 : i32
    return %c0_i32, %c0_i32_0 : i32, i32
  }
  func.func @transform_11(%arg0: i32) -> (i32, i32) {
    %c0_i32 = arith.constant 0 : i32
    %c0_i32_0 = arith.constant 0 : i32
    return %arg0, %c0_i32 : i32, i32
  }
}

</mosaic_0001>

<bundles_post_ra>
// kernel: tpu_custom_call.1
= control target key start
LH: loop header
LB: loop body
LE: loop exit
PB: predicated region body
PF: predicated region fallthrough
CT: control target
= control target key end

     0   :  { %16 = vsyncpa [#allocation4], 0  ;;  %s3937_s0 = inlined_call_operand.vmem [shape: f32[64,16], index: 0, kind: input, shape index: {}]   ;;  %s3938_s1 = inlined_call_operand.hbm [shape: f32[16,128], index: 1, kind: input, shape index: {}]   ;;  %s3939_s2 = inlined_call_operand.vmem [shape: f32[32,128], index: 2, kind: input, shape index: {}]   ;;  %s3940_s3 = inlined_call_operand.vmem [shape: f32[1,128], index: 3, kind: input, shape index: {}]   ;;  %s3941_s4 = inlined_call_operand.vmem [shape: f32[32,128], index: 4, kind: input, shape index: {}]   ;;  %s3942_s5 = inlined_call_operand.vmem [shape: f32[32,128], index: 5, kind: input, shape index: {}]   ;;  %s3943_s6 = inlined_call_operand.vmem [shape: f32[1,128], index: 6, kind: input, shape index: {}]   ;;  %s3944_s7 = inlined_call_operand.vmem [shape: f32[1,32], index: 7, kind: input, shape index: {}]   ;;  %s3945_s8 = inlined_call_operand.vmem [shape: f32[1,32], index: 8, kind: input, shape index: {}]   ;;  %s3946_s9 = inlined_call_operand.hbm [shape: f32[32,128], index: 9, kind: input, shape index: {}]   ;;  %s3947_s10 = inlined_call_operand.vmem [shape: f32[1,128], index: 10, kind: input, shape index: {}]   ;;  %s3948_s11 = inlined_call_operand.hbm [shape: f32[8,128], index: 11, kind: output, shape index: {}]  }
   0x1   :  { %17 = vsyncpa [#allocation7], 0 }
   0x2   :  { %18 = vsyncpa [#allocation5], 0  ;;  %s3398_s17 = smov [#allocation3]   ;;  %s3326_s21 = scalar_lea.hbm %s3938_s1, 256 }
   0x3   :  { %s26_s18 = sshll.u32 %s3398_s17, 4  ;;  %p3327_p0 = scmp.ne.s32.totalorder %s3938_s1, %s3326_s21  ;;  %s27_s18 = int_to_ptr.vmem [resolvable:$true] %s26_s18 }
   0x4   :  { %p3330_p1 = scmp.lt.u32.totalorder %s3326_s21, %s3938_s1 }
   0x6   :  { %p3332_p2 = pnand %p3330_p1, %p3327_p0 }
   0x8   :  { %3335 = shalt.err (!%p3332_p2)
}
   0x9   :  { %s3336_s26 = scalar_lea.vmem %s27_s18, 256  ;;  %p3341_p4 = scmp.lt.s32.totalorder %s27_s18, %s27_s18 }
   0xa   :  { %p3337_p3 = scmp.ne.s32.totalorder %s27_s18, %s3336_s26  ;;  %p3342_p5 = scmp.lt.s32.totalorder %s3336_s26, %s3336_s26 }
   0xc   :  { %p3343_p6 = por %p3342_p5, %p3341_p4 }
   0xe   :  { %p3344_p7 = pnand %p3343_p6, %p3337_p3 }
  0x10   :  { %3347 = shalt.err (!%p3344_p7)
}
  0x11   :  { %s3399_s27 = smov 128   ;;  %s3400_s28 = smov 8  }
  0x12   :  { %32 = dma.hbm_to_vmem [thread:$0]  %s3938_s1, 256, %s27_s18, [#allocation4], %s3399_s27, %s3399_s27, %s3400_s28  }
  0x13   :  { %s3401_s12 = smov [#allocation6]   ;;  %s3348_s16 = scalar_lea.hbm %s3946_s9, 512 }
  0x14   :  { %s52_s13 = sshll.u32 %s3401_s12, 4  ;;  %p3349_p8 = scmp.ne.s32.totalorder %s3946_s9, %s3348_s16  ;;  %s53_s13 = int_to_ptr.vmem [resolvable:$true] %s52_s13 }
  0x15   :  { %p3352_p9 = scmp.lt.u32.totalorder %s3348_s16, %s3946_s9 }
  0x17   :  { %p3354_p10 = pnand %p3352_p9, %p3349_p8 }
  0x19   :  { %3357 = shalt.err (!%p3354_p10)
}
  0x1a   :  { %s3358_s22 = scalar_lea.vmem %s53_s13, 512  ;;  %p3363_p12 = scmp.lt.s32.totalorder %s53_s13, %s53_s13 }
  0x1b   :  { %p3359_p11 = scmp.ne.s32.totalorder %s53_s13, %s3358_s22  ;;  %p3364_p13 = scmp.lt.s32.totalorder %s3358_s22, %s3358_s22 }
  0x1d   :  { %p3365_p0 = por %p3364_p13, %p3363_p12 }
  0x1f   :  { %p3366_p1 = pnand %p3365_p0, %p3359_p11 }
  0x21   :  { %3369 = shalt.err (!%p3366_p1)
}
  0x22   :  { %58 = dma.hbm_to_vmem [thread:$0]  %s3946_s9, 512, %s53_s13, [#allocation7], %s3399_s27, %s3399_s27, %s3400_s28  }
  0x23   :  { %3392 = dma.done.wait [#allocation4], 256  }
  0x24   :  { %3393 = vsyncadd [#allocation4], 4294967040 }
  0x25   :  { %3394 = dma.done.wait [#allocation7], 512  }
  0x26   :  { %3395 = vsyncadd [#allocation7], 4294966784  ;;  %v3402_v0 = vmov 0.0|0.0   ;;  %vm3403_vm0 = vmmov 0   ;;  %v3404_v1 = vmov 0.0   ;;  %v230_v2 = vld [vmem:[%s3942_s5] sm:$0xff] }
  0x27   :  { %3035 = vmatprep.subr.bf16.mxu1 %v3402_v0  ;;  %2764 = vmatprep.mubr.msk.f32.mxu1 %vm3403_vm0, %v3404_v1  ;;  %v231_v3 = vld [vmem:[%s3942_s5 + $0x8] sm:$0xff]  ;;  %v232_v4 = vld [vmem:[%s3942_s5 + $0x10] sm:$0xff]  ;;  %vm84_vm1 = vcmask 130048   ;;  %v233_v6 = vld [vmem:[%s3942_s5 + $0x18] sm:$0xff]  ;;  %s3405_s18 = smov 64   ;;  %vm242_vm2 = vcmask 261120  }
  0x28   :  { %v3505_v5 = vpack.c.bf16 %v231_v3, %v230_v2  ;;  %v75_v7 = vld [vmem:[#allocation3] sm:$0xff]  ;;  %v76_v8 = vld [vmem:[#allocation3 + $0x8] sm:$0xff]  ;;  %v3514_v11 = vpack.c.bf16 %v233_v6, %v232_v4  ;;  %v224_v16 = vld [vmem:[%s3939_s2 + $0x10] sm:$0xff]  ;;  %s3407_s1 = smov 96   ;;  %s3408_s24 = smov [#allocation8]  }
  0x29   :  { %v3031_v9 = vpack.c.bf16 %v76_v8, %v75_v7  ;;  %v67_v10 = vld [vmem:[%s3937_s0] sm:$0xff]  ;;  %v223_v13 = vld [vmem:[%s3939_s2 + $0x8] sm:$0xff]  ;;  %v225_v17 = vld [vmem:[%s3939_s2 + $0x18] sm:$0xff]  ;;  %s2543_s25 = sshll.u32 %s3408_s24, 4  ;;  %s2544_s25 = int_to_ptr.vmem [resolvable:$true] %s2543_s25 }
  0x2a   :  { %3037 = vmatpush3.bf16.msra.mxu1 %v3505_v5  ;;  %2744 = vmatprep.mubr.msk.f32.mxu0 %vm84_vm1, %v67_v10  ;;  %v222_v12 = vld [vmem:[%s3939_s2] sm:$0xff]  ;;  %v68_v14 = vld [vmem:[%s3937_s0 + $0x8] sm:$0xff]  ;;  %v3541_v18 = vpack.c.bf16 %v225_v17, %v224_v16  ;;  %v69_v40 = vld [vmem:[%s3937_s0 + $0x10] sm:$0xff]  ;;  %s3370_s26 = scalar_lea.vmem %s2544_s25, 128  ;;  %p3375_p3 = scmp.lt.s32.totalorder %s2544_s25, %s2544_s25 }
  0x2b   :  { %3038 = vmatprep.subr.bf16.mxu1 %v3402_v0  ;;  %3032 = vmatprep.subr.bf16.mxu0 %v3031_v9  ;;  %v3529_v15 = vpack.c.bf16 %v223_v13, %v222_v12  ;;  %v3562_v23 = vld [vmem:[%s3940_s3] ss:$0 sm:$0xff]  ;;  %s3406_s3 = smov 32   ;;  %v227_v39 = vld [vmem:[%s3941_s4 + $0x8] sm:$0xff]  ;;  %v70_v42 = vld [vmem:[%s3937_s0 + $0x18] sm:$0xff]  ;;  %p3371_p2 = scmp.ne.s32.totalorder %s2544_s25, %s3370_s26 }
  0x2c   :  { %3034 = vmatpush3.bf16.msra.mxu0 %v3031_v9  ;;  %v226_v38 = vld [vmem:[%s3941_s4] sm:$0xff]  ;;  %v228_v44 = vld [vmem:[%s3941_s4 + $0x10] sm:$0xff]  ;;  %v229_v45 = vld [vmem:[%s3941_s4 + $0x18] sm:$0xff]  ;;  %p3376_p4 = scmp.lt.s32.totalorder %s3370_s26, %s3370_s26 }
  0x2d   :  { %3047 = vmatprep.subr.bf16.mxu0 %v3402_v0  ;;  %v3579_v41 = vpack.c.bf16 %v227_v39, %v226_v38  ;;  %v71_v43 = vld [vmem:[%s3937_s0 + $0x20] sm:$0xff]  ;;  %v72_v46 = vld [vmem:[%s3937_s0 + $0x28] sm:$0xff]  ;;  %v3600_v47 = vpack.c.bf16 %v229_v45, %v228_v44  ;;  %v73_v48 = vld [vmem:[%s3937_s0 + $0x30] sm:$0xff] }
  0x2e   :  { %3040 = vmatpush3.bf16.msra.mxu1 %v3514_v11  ;;  %v74_v49 = vld [vmem:[%s3937_s0 + $0x38] sm:$0xff]  ;;  %v3647_v60 = vld [vmem:[%s3943_s6] ss:$0 sm:$0xff]  ;;  %p3377_p5 = por %p3376_p4, %p3375_p3 }
  0x2f   :  { %3041 = vmatprep.subr.bf16.mxu1 %v3402_v0  ;;  %2745 = vmatmul.mubr.msk.f32.vlgmr.msra.gmra.mrb[0].mxu0 %vm84_vm1, %v68_v14 }
  0x30   :  { %2747 = vmatprep.mubr.msk.f32.mxu0 %vm84_vm1, %v69_v40  ;;  %3049 = vmatpush3.bf16.msra.mxu0 %v3579_v41  ;;  %p3378_p6 = pnand %p3377_p5, %p3371_p2 }
  0x31   :  { %2765 = vmatmul.mubr.f32.vlgmr.msra.gmra.mrb[0].mxu1 %v3404_v1  ;;  %3050 = vmatprep.subr.bf16.mxu0 %v3402_v0 }
  0x32   :  { %3043 = vmatpush3.bf16.msra.mxu1 %v3529_v15  ;;  %2775 = vmatprep.mubr.msk.f32.mxu1 %vm3403_vm0, %v3404_v1 }
  0x33   :  { %3044 = vmatprep.subr.bf16.mxu1 %v3402_v0  ;;  %2748 = vmatmul.mubr.msk.f32.gmra.mrb[2].mxu0 %vm84_vm1, %v70_v42 }
  0x34   :  { %2750 = vmatprep.mubr.msk.f32.mxu0 %vm84_vm1, %v71_v43  ;;  %3052 = vmatpush3.bf16.msra.mxu0 %v3600_v47 }
  0x35   :  { %3059 = vmatprep.subr.bf16.mxu0 %v3402_v0 }
  0x36   :  { %3046 = vmatpush3.bf16.msra.mxu1 %v3541_v18 }
  0x37   :  { %3053 = vmatprep.subr.bf16.mxu1 %v3402_v0  ;;  %2751 = vmatmul.mubr.msk.f32.gmra.mrb[4].mxu0 %vm84_vm1, %v72_v46 }
  0x38   :  { %2753 = vmatprep.mubr.msk.f32.mxu0 %vm84_vm1, %v73_v48 }
  0x39   :  { %2776 = vmatmul.mubr.f32.vlgmr.msra.gmra.mrb[2].mxu1 %v3404_v1 }
  0x3a   :  { %3055 = vmatpush3.bf16.msra.mxu1 %v3505_v5  ;;  %2797 = vmatprep.mubr.msk.f32.mxu1 %vm3403_vm0, %v3404_v1 }
  0x3b   :  { %3056 = vmatprep.subr.bf16.mxu1 %v3402_v0  ;;  %2754 = vmatmul.mubr.msk.f32.gmra.mrb[6].mxu0 %vm84_vm1, %v74_v49 }
  0x3c   :  { %2786 = vmatprep.mubr.msk.f32.mxu0 %vm3403_vm0, %v3404_v1 }
  0x3e   :  { %3058 = vmatpush3.bf16.msra.mxu1 %v3514_v11 }
  0x3f   :  { %3065 = vmatprep.subr.bf16.mxu1 %v3402_v0 }
 0x102   :  { %v3555_v19 = vpop.f32.mrb[0].mxu0 }
 0x103   :  { %v175_v20 = vpop.f32.mrb[1].mxu0  ;;  %v181_v3 = vadd.f32 %v3555_v19, %v3562_v23 }
 0x104   :  { %v3557_v21 = vpop.f32.mrb[0].mxu1  ;;  %v176_v24 = vadd.f32 %v3562_v23, %v175_v20 }
 0x105   :  { %v2766_v22 = vpop.f32.mrb[1].mxu1 }
 0x106   :  { %v3618_v53 = vpop.f32.mrb[2].mxu0 }
 0x107   :  { %v3620_v54 = vpop.f32.mrb[3].mxu0 }
 0x108   :  { %v186_v48 = vadd.f32 %v3562_v23, %v3620_v54 }
 0x10a   :  { %v3622_v55 = vpop.f32.mrb[4].mxu0 }
 0x10b   :  { %v3624_v56 = vpop.f32.mrb[5].mxu0 }
 0x10c   :  { %v382_v25 = vpop.f32.mrb[2].mxu1 }
 0x10d   :  { %v386_v26 = vadd.f32 %v382_v25, %v176_v24  ;;  %v2777_v27 = vpop.f32.mrb[3].mxu1 }
 0x10e   :  { %v3626_v57 = vpop.f32.mrb[6].mxu0 }
 0x10f   :  { %3196 = vtanh.f32 %v386_v26  ;;  %v2563_v29 = vmul.f32 -1.442695, %v386_v26  ;;  %v3628_v58 = vpop.f32.mrb[7].mxu0 }
 0x111   :  { %3198 = vpow2.f32 %v2563_v29 }
 0x119   :  { %v3197_v28 = vpop.eup %3196 }
 0x11a   :  { %396 = vrot.lane.b32.xlu0 %v3197_v28, %s3405_s18 }
 0x11b   :  { %v3199_v30 = vpop.eup %3198 }
 0x11c   :  { %v390_v31 = vadd.f32 1.0, %v3199_v30 }
 0x11e   :  { %3200 = vrcp.f32 %v390_v31 }
 0x128   :  { %v3201_v32 = vpop.eup %3200 }
 0x129   :  { %v394_v35 = vmul.f32 0.0, %v3201_v32 }
 0x18c   :  { %v397_v33 = vpop.permute.xlu0 %396 }
 0x18d   :  { %v399_v34 = vmul.f32 %v3201_v32, %v397_v33 }
 0x18f   :  { %401 = vrot.lane.b32.xlu0 %v399_v34, %s3406_s3 }
 0x201   :  { %v402_v36 = vpop.permute.xlu0 %401 }
 0x202   :  { %v3567_v37 = vadd.f32 %v402_v36, %v394_v35 }
 0x204   :  { %3202 = vtanh.f32 %v3567_v37 }
 0x20e   :  { %v3203_v50 = vpop.eup %3202 }
 0x20f   :  { %407 = vrot.lane.b32.xlu1 %v3203_v50, %s3405_s18 }
 0x281   :  { %v408_v51 = vpop.permute.xlu1 %407 }
 0x282   :  { %v410_v52 = vmul.f32 %v3201_v32, %v408_v51 }
 0x284   :  { %412 = vrot.lane.b32.xlu1 %v410_v52, %s3406_s3 }
 0x2f6   :  { %v413_v59 = vpop.permute.xlu1 %412 }
 0x2f7   :  { %2787 = vmatmul.mubr.msk.f32.vlgmr.msra.gmra.mrb[8].mxu0 %vm242_vm2, %v413_v59 }
 0x2f8   :  { %3061 = vmatpush3.bf16.msra.mxu0 %v3529_v15  ;;  %2808 = vmatprep.mubr.msk.f32.mxu0 %vm3403_vm0, %v3404_v1 }
 0x2f9   :  { %3062 = vmatprep.subr.bf16.mxu0 %v3402_v0 }
 0x2fc   :  { %3064 = vmatpush3.bf16.msra.mxu0 %v3541_v18 }
 0x2fd   :  { %3071 = vmatprep.subr.bf16.mxu0 %v3402_v0 }
 0x2ff   :  { %2809 = vmatmul.mubr.msk.f32.vlgmr.msra.gmra.mrb[10].mxu0 %vm242_vm2, %v413_v59 }
 0x300   :  { %3073 = vmatpush3.bf16.msra.mxu0 %v3505_v5  ;;  %2830 = vmatprep.mubr.msk.f32.mxu0 %vm3403_vm0, %v3404_v1 }
 0x301   :  { %3074 = vmatprep.subr.bf16.mxu0 %v3402_v0 }
 0x304   :  { %3076 = vmatpush3.bf16.msra.mxu0 %v3514_v11 }
 0x305   :  { %3083 = vmatprep.subr.bf16.mxu0 %v3402_v0 }
 0x3ca   :  { %v482_v61 = vpop.f32.mrb[8].mxu0 }
 0x3cb   :  { %v483_v62 = vadd.f32 %v482_v61, %v3557_v21  ;;  %v2788_v63 = vpop.f32.mrb[9].mxu0 }
 0x3cd   :  { %v486_v2 = vadd.f32 %v3647_v60, %v483_v62 }
 0x3cf   :  { %3204 = vtanh.f32 %v486_v2  ;;  %v2565_v10 = vmul.f32 -1.442695, %v486_v2 }
 0x3d2   :  { %v653_v4 = vpop.f32.mrb[10].mxu0 }
 0x3d3   :  { %v657_v6 = vadd.f32 %v653_v4, %v181_v3  ;;  %v2810_v7 = vpop.f32.mrb[11].mxu0 }
 0x3d5   :  { %3206 = vtanh.f32 %v657_v6  ;;  %v2568_v12 = vmul.f32 -1.442695, %v657_v6 }
 0x3d6   :  { %3208 = vpow2.f32 %v2565_v10 }
 0x3d7   :  { %3210 = vpow2.f32 %v2568_v12 }
 0x3d9   :  { %v3205_v8 = vpop.eup %3204 }
 0x3da   :  { %496 = vrot.lane.b32.xlu0 %v3205_v8, %s3405_s18 }
 0x3df   :  { %v3207_v9 = vpop.eup %3206 }
 0x3e0   :  { %667 = vrot.lane.b32.xlu1 %v3207_v9, %s3405_s18  ;;  %v3209_v13 = vpop.eup %3208 }
 0x3e1   :  { %v490_v14 = vadd.f32 1.0, %v3209_v13  ;;  %v3211_v16 = vpop.eup %3210 }
 0x3e2   :  { %v661_v17 = vadd.f32 1.0, %v3211_v16 }
 0x3e3   :  { %3212 = vrcp.f32 %v490_v14 }
 0x3e4   :  { %3214 = vrcp.f32 %v661_v17 }
 0x3ed   :  { %v3213_v19 = vpop.eup %3212 }
 0x3ee   :  { %v3215_v22 = vpop.eup %3214  ;;  %v494_v26 = vmul.f32 0.0, %v3213_v19 }
 0x3ef   :  { %v665_v29 = vmul.f32 %v3215_v22, %v3567_v37 }
 0x44c   :  { %v497_v20 = vpop.permute.xlu0 %496 }
 0x44d   :  { %v499_v21 = vmul.f32 %v3213_v19, %v497_v20 }
 0x44f   :  { %501 = vrot.lane.b32.xlu0 %v499_v21, %s3406_s3 }
 0x452   :  { %v668_v24 = vpop.permute.xlu1 %667 }
 0x453   :  { %v670_v25 = vmul.f32 %v3215_v22, %v668_v24 }
 0x455   :  { %672 = vrot.lane.b32.xlu1 %v670_v25, %s3406_s3 }
 0x4c1   :  { %v502_v27 = vpop.permute.xlu0 %501 }
 0x4c2   :  { %v3657_v28 = vadd.f32 %v502_v27, %v494_v26 }
 0x4c4   :  { %3216 = vtanh.f32 %v3657_v28 }
 0x4c7   :  { %v673_v30 = vpop.permute.xlu1 %672 }
 0x4c8   :  { %v3661_v31 = vadd.f32 %v673_v30, %v665_v29 }
 0x4ca   :  { %3218 = vtanh.f32 %v3661_v31 }
 0x4ce   :  { %v3217_v32 = vpop.eup %3216 }
 0x4cf   :  { %507 = vrot.lane.b32.xlu0 %v3217_v32, %s3405_s18 }
 0x4d4   :  { %v3219_v33 = vpop.eup %3218 }
 0x4d5   :  { %678 = vrot.lane.b32.xlu1 %v3219_v33, %s3405_s18 }
 0x541   :  { %v508_v34 = vpop.permute.xlu0 %507 }
 0x542   :  { %v510_v35 = vmul.f32 %v3213_v19, %v508_v34 }
 0x544   :  { %513 = vrot.lane.b32.xlu0 %v510_v35, %s3406_s3  ;;  %v191_v35 = vadd.f32 %v3618_v53, %v3562_v23 }
 0x547   :  { %v679_v36 = vpop.permute.xlu1 %678 }
 0x548   :  { %v681_v38 = vmul.f32 %v3215_v22, %v679_v36 }
 0x54a   :  { %683 = vrot.lane.b32.xlu1 %v681_v38, %s3406_s3 }
 0x5b6   :  { %v514_v37 = vpop.permute.xlu0 %513 }
 0x5b7   :  { %2798 = vmatmul.mubr.msk.f32.vlgmr.msra.gmra.mrb[4].mxu1 %vm242_vm2, %v514_v37 }
 0x5b8   :  { %3067 = vmatpush3.bf16.msra.mxu1 %v3579_v41  ;;  %2819 = vmatprep.mubr.msk.f32.mxu1 %vm3403_vm0, %v3404_v1 }
 0x5b9   :  { %3068 = vmatprep.subr.bf16.mxu1 %v3402_v0 }
 0x5bc   :  { %3070 = vmatpush3.bf16.msra.mxu1 %v3600_v47  ;;  %v684_v39 = vpop.permute.xlu1 %683 }
 0x5bd   :  { %3077 = vmatprep.subr.bf16.mxu1 %v3402_v0 }
 0x5bf   :  { %2820 = vmatmul.mubr.msk.f32.vlgmr.msra.gmra.mrb[6].mxu1 %vm242_vm2, %v684_v39 }
 0x5c0   :  { %3079 = vmatpush3.bf16.msra.mxu1 %v3529_v15  ;;  %2841 = vmatprep.mubr.msk.f32.mxu1 %vm3403_vm0, %v3404_v1 }
 0x5c1   :  { %3080 = vmatprep.subr.bf16.mxu1 %v3402_v0 }
 0x5c4   :  { %3082 = vmatpush3.bf16.msra.mxu1 %v3541_v18 }
 0x5c5   :  { %3089 = vmatprep.subr.bf16.mxu1 %v3402_v0 }
 0x5c7   :  { %2842 = vmatmul.mubr.msk.f32.vlgmr.msra.gmra.mrb[8].mxu1 %vm242_vm2, %v684_v39 }
 0x5c8   :  { %3091 = vmatpush3.bf16.msra.mxu1 %v3505_v5  ;;  %2863 = vmatprep.mubr.msk.f32.mxu1 %vm3403_vm0, %v3404_v1 }
 0x5c9   :  { %3092 = vmatprep.subr.bf16.mxu1 %v3402_v0 }
 0x5cc   :  { %3094 = vmatpush3.bf16.msra.mxu1 %v3514_v11 }
 0x5cd   :  { %3101 = vmatprep.subr.bf16.mxu1 %v3402_v0 }
 0x68a   :  { %v583_v40 = vpop.f32.mrb[4].mxu1 }
 0x68b   :  { %v2799_v42 = vpop.f32.mrb[5].mxu1 }
 0x692   :  { %v753_v43 = vpop.f32.mrb[6].mxu1 }
 0x693   :  { %v754_v44 = vadd.f32 %v753_v43, %v583_v40  ;;  %v2821_v45 = vpop.f32.mrb[7].mxu1 }
 0x695   :  { %v757_v46 = vadd.f32 %v3647_v60, %v754_v44 }
 0x697   :  { %3220 = vtanh.f32 %v757_v46  ;;  %v2570_v61 = vmul.f32 -1.442695, %v757_v46 }
 0x69a   :  { %v924_v49 = vpop.f32.mrb[8].mxu1 }
 0x69b   :  { %v928_v50 = vadd.f32 %v924_v49, %v186_v48  ;;  %v2843_v51 = vpop.f32.mrb[9].mxu1 }
 0x69d   :  { %3222 = vtanh.f32 %v928_v50  ;;  %v2573_v62 = vmul.f32 -1.442695, %v928_v50 }
 0x69e   :  { %3224 = vpow2.f32 %v2570_v61 }
 0x69f   :  { %3226 = vpow2.f32 %v2573_v62 }
 0x6a1   :  { %v3221_v52 = vpop.eup %3220 }
 0x6a2   :  { %767 = vrot.lane.b32.xlu0 %v3221_v52, %s3405_s18 }
 0x6a7   :  { %v3223_v59 = vpop.eup %3222 }
 0x6a8   :  { %938 = vrot.lane.b32.xlu1 %v3223_v59, %s3405_s18  ;;  %v3225_v63 = vpop.eup %3224 }
 0x6a9   :  { %v761_v2 = vadd.f32 1.0, %v3225_v63  ;;  %v3227_v3 = vpop.eup %3226 }
 0x6aa   :  { %v932_v4 = vadd.f32 1.0, %v3227_v3 }
 0x6ab   :  { %3228 = vrcp.f32 %v761_v2 }
 0x6ac   :  { %3230 = vrcp.f32 %v932_v4 }
 0x6b5   :  { %v3229_v54 = vpop.eup %3228 }
 0x6b6   :  { %v3231_v8 = vpop.eup %3230  ;;  %v765_v12 = vmul.f32 %v3229_v54, %v3657_v28 }
 0x6b7   :  { %v936_v16 = vmul.f32 %v3231_v8, %v3661_v31 }
 0x714   :  { %v768_v6 = vpop.permute.xlu0 %767 }
 0x715   :  { %v770_v7 = vmul.f32 %v3229_v54, %v768_v6 }
 0x717   :  { %772 = vrot.lane.b32.xlu0 %v770_v7, %s3406_s3 }
 0x71a   :  { %v939_v9 = vpop.permute.xlu1 %938 }
 0x71b   :  { %v941_v10 = vmul.f32 %v3231_v8, %v939_v9 }
 0x71d   :  { %943 = vrot.lane.b32.xlu1 %v941_v10, %s3406_s3 }
 0x789   :  { %v773_v13 = vpop.permute.xlu0 %772 }
 0x78a   :  { %v3697_v14 = vadd.f32 %v773_v13, %v765_v12 }
 0x78c   :  { %3232 = vtanh.f32 %v3697_v14 }
 0x78f   :  { %v944_v17 = vpop.permute.xlu1 %943 }
 0x790   :  { %v3701_v19 = vadd.f32 %v944_v17, %v936_v16 }
 0x792   :  { %3234 = vtanh.f32 %v3701_v19 }
 0x796   :  { %v3233_v20 = vpop.eup %3232 }
 0x797   :  { %778 = vrot.lane.b32.xlu0 %v3233_v20, %s3405_s18 }
 0x79c   :  { %v3235_v21 = vpop.eup %3234 }
 0x79d   :  { %949 = vrot.lane.b32.xlu1 %v3235_v21, %s3405_s18 }
 0x809   :  { %v779_v22 = vpop.permute.xlu0 %778 }
 0x80a   :  { %v781_v24 = vmul.f32 %v3229_v54, %v779_v22  ;;  %v196_v22 = vadd.f32 %v3562_v23, %v3624_v56 }
 0x80c   :  { %784 = vrot.lane.b32.xlu0 %v781_v24, %s3406_s3 }
 0x80f   :  { %v950_v25 = vpop.permute.xlu1 %949 }
 0x810   :  { %v952_v26 = vmul.f32 %v3231_v8, %v950_v25 }
 0x812   :  { %954 = vrot.lane.b32.xlu1 %v952_v26, %s3406_s3 }
 0x87e   :  { %v785_v27 = vpop.permute.xlu0 %784 }
 0x87f   :  { %2831 = vmatmul.mubr.msk.f32.vlgmr.msra.gmra.mrb[12].mxu0 %vm242_vm2, %v785_v27 }
 0x880   :  { %3085 = vmatpush3.bf16.msra.mxu0 %v3579_v41  ;;  %2852 = vmatprep.mubr.msk.f32.mxu0 %vm3403_vm0, %v3404_v1 }
 0x881   :  { %3086 = vmatprep.subr.bf16.mxu0 %v3402_v0 }
 0x884   :  { %3088 = vmatpush3.bf16.msra.mxu0 %v3600_v47  ;;  %v955_v28 = vpop.permute.xlu1 %954 }
 0x885   :  { %3095 = vmatprep.subr.bf16.mxu0 %v3402_v0 }
 0x887   :  { %2853 = vmatmul.mubr.msk.f32.vlgmr.msra.gmra.mrb[14].mxu0 %vm242_vm2, %v955_v28 }
 0x888   :  { %3097 = vmatpush3.bf16.msra.mxu0 %v3529_v15  ;;  %2874 = vmatprep.mubr.msk.f32.mxu0 %vm3403_vm0, %v3404_v1 }
 0x889   :  { %3098 = vmatprep.subr.bf16.mxu0 %v3402_v0 }
 0x88c   :  { %3100 = vmatpush3.bf16.msra.mxu0 %v3541_v18 }
 0x88d   :  { %3107 = vmatprep.subr.bf16.mxu0 %v3402_v0 }
 0x88f   :  { %2875 = vmatmul.mubr.msk.f32.vlgmr.msra.gmra.mrb[16].mxu0 %vm242_vm2, %v955_v28 }
 0x890   :  { %3109 = vmatpush3.bf16.msra.mxu0 %v3505_v5  ;;  %2896 = vmatprep.mubr.msk.f32.mxu0 %vm3403_vm0, %v3404_v1 }
 0x891   :  { %3110 = vmatprep.subr.bf16.mxu0 %v3402_v0 }
 0x894   :  { %3112 = vmatpush3.bf16.msra.mxu0 %v3514_v11 }
 0x895   :  { %3119 = vmatprep.subr.bf16.mxu0 %v3402_v0 }
 0x952   :  { %v854_v29 = vpop.f32.mrb[12].mxu0 }
 0x953   :  { %v2832_v30 = vpop.f32.mrb[13].mxu0 }
 0x95a   :  { %v1024_v31 = vpop.f32.mrb[14].mxu0 }
 0x95b   :  { %v1025_v32 = vadd.f32 %v1024_v31, %v854_v29  ;;  %v2854_v33 = vpop.f32.mrb[15].mxu0 }
 0x95d   :  { %v1028_v34 = vadd.f32 %v3647_v60, %v1025_v32 }
 0x95f   :  { %3236 = vtanh.f32 %v1028_v34  ;;  %v2575_v42 = vmul.f32 -1.442695, %v1028_v34 }
 0x962   :  { %v1195_v36 = vpop.f32.mrb[16].mxu0 }
 0x963   :  { %v1199_v38 = vadd.f32 %v1195_v36, %v191_v35  ;;  %v2876_v37 = vpop.f32.mrb[17].mxu0 }
 0x965   :  { %3238 = vtanh.f32 %v1199_v38  ;;  %v2578_v43 = vmul.f32 -1.442695, %v1199_v38 }
 0x966   :  { %3240 = vpow2.f32 %v2575_v42 }
 0x967   :  { %3242 = vpow2.f32 %v2578_v43 }
 0x969   :  { %v3237_v39 = vpop.eup %3236 }
 0x96a   :  { %1038 = vrot.lane.b32.xlu0 %v3237_v39, %s3405_s18 }
 0x96f   :  { %v3239_v40 = vpop.eup %3238 }
 0x970   :  { %1209 = vrot.lane.b32.xlu1 %v3239_v40, %s3405_s18  ;;  %v3241_v44 = vpop.eup %3240 }
 0x971   :  { %v1032_v45 = vadd.f32 1.0, %v3241_v44  ;;  %v3243_v46 = vpop.eup %3242 }
 0x972   :  { %v1203_v48 = vadd.f32 1.0, %v3243_v46 }
 0x973   :  { %3244 = vrcp.f32 %v1032_v45 }
 0x974   :  { %3246 = vrcp.f32 %v1203_v48 }
 0x97d   :  { %v3245_v53 = vpop.eup %3244 }
 0x97e   :  { %v3247_v51 = vpop.eup %3246  ;;  %v1036_v61 = vmul.f32 %v3245_v53, %v3697_v14 }
 0x97f   :  { %v1207_v2 = vmul.f32 %v3247_v51, %v3701_v19 }
 0x9dc   :  { %v1039_v49 = vpop.permute.xlu0 %1038 }
 0x9dd   :  { %v1041_v50 = vmul.f32 %v3245_v53, %v1039_v49 }
 0x9df   :  { %1043 = vrot.lane.b32.xlu0 %v1041_v50, %s3406_s3 }
 0x9e2   :  { %v1210_v52 = vpop.permute.xlu1 %1209 }
 0x9e3   :  { %v1212_v59 = vmul.f32 %v3247_v51, %v1210_v52 }
 0x9e5   :  { %1214 = vrot.lane.b32.xlu1 %v1212_v59, %s3406_s3 }
 0xa51   :  { %v1044_v62 = vpop.permute.xlu0 %1043 }
 0xa52   :  { %v3737_v63 = vadd.f32 %v1044_v62, %v1036_v61 }
 0xa54   :  { %3248 = vtanh.f32 %v3737_v63 }
 0xa57   :  { %v1215_v3 = vpop.permute.xlu1 %1214 }
 0xa58   :  { %v3741_v4 = vadd.f32 %v1215_v3, %v1207_v2 }
 0xa5a   :  { %3250 = vtanh.f32 %v3741_v4 }
 0xa5e   :  { %v3249_v54 = vpop.eup %3248 }
 0xa5f   :  { %1049 = vrot.lane.b32.xlu0 %v3249_v54, %s3405_s18 }
 0xa64   :  { %v3251_v6 = vpop.eup %3250 }
 0xa65   :  { %1220 = vrot.lane.b32.xlu1 %v3251_v6, %s3405_s18  ;;  %v201_v6 = vadd.f32 %v3622_v55, %v3562_v23 }
 0xad1   :  { %v1050_v7 = vpop.permute.xlu0 %1049 }
 0xad2   :  { %v1052_v8 = vmul.f32 %v3245_v53, %v1050_v7 }
 0xad4   :  { %1055 = vrot.lane.b32.xlu0 %v1052_v8, %s3406_s3 }
 0xad7   :  { %v1221_v9 = vpop.permute.xlu1 %1220 }
 0xad8   :  { %v1223_v10 = vmul.f32 %v3247_v51, %v1221_v9 }
 0xada   :  { %1225 = vrot.lane.b32.xlu1 %v1223_v10, %s3406_s3 }
 0xb46   :  { %v1056_v12 = vpop.permute.xlu0 %1055 }
 0xb47   :  { %2864 = vmatmul.mubr.msk.f32.vlgmr.msra.gmra.mrb[10].mxu1 %vm242_vm2, %v1056_v12 }
 0xb48   :  { %3103 = vmatpush3.bf16.msra.mxu1 %v3579_v41  ;;  %2885 = vmatprep.mubr.msk.f32.mxu1 %vm3403_vm0, %v3404_v1 }
 0xb49   :  { %3104 = vmatprep.subr.bf16.mxu1 %v3402_v0 }
 0xb4c   :  { %3106 = vmatpush3.bf16.msra.mxu1 %v3600_v47  ;;  %v1226_v13 = vpop.permute.xlu1 %1225 }
 0xb4d   :  { %3113 = vmatprep.subr.bf16.mxu1 %v3402_v0 }
 0xb4f   :  { %2886 = vmatmul.mubr.msk.f32.vlgmr.msra.gmra.mrb[12].mxu1 %vm242_vm2, %v1226_v13 }
 0xb50   :  { %3115 = vmatpush3.bf16.msra.mxu1 %v3529_v15  ;;  %2907 = vmatprep.mubr.msk.f32.mxu1 %vm3403_vm0, %v3404_v1 }
 0xb51   :  { %3116 = vmatprep.subr.bf16.mxu1 %v3402_v0 }
 0xb54   :  { %3118 = vmatpush3.bf16.msra.mxu1 %v3541_v18 }
 0xb55   :  { %3125 = vmatprep.subr.bf16.mxu1 %v3402_v0 }
 0xb57   :  { %2908 = vmatmul.mubr.msk.f32.vlgmr.msra.gmra.mrb[14].mxu1 %vm242_vm2, %v1226_v13 }
 0xb58   :  { %3127 = vmatpush3.bf16.msra.mxu1 %v3505_v5  ;;  %2929 = vmatprep.mubr.msk.f32.mxu1 %vm3403_vm0, %v3404_v1 }
 0xb59   :  { %3128 = vmatprep.subr.bf16.mxu1 %v3402_v0 }
 0xb5c   :  { %3130 = vmatpush3.bf16.msra.mxu1 %v3514_v11 }
 0xb5d   :  { %3137 = vmatprep.subr.bf16.mxu1 %v3402_v0 }
 0xc1a   :  { %v1125_v14 = vpop.f32.mrb[10].mxu1 }
 0xc1b   :  { %v2865_v16 = vpop.f32.mrb[11].mxu1 }
 0xc22   :  { %v1295_v17 = vpop.f32.mrb[12].mxu1 }
 0xc23   :  { %v1296_v19 = vadd.f32 %v1295_v17, %v1125_v14  ;;  %v2887_v20 = vpop.f32.mrb[13].mxu1 }
 0xc25   :  { %v1299_v21 = vadd.f32 %v3647_v60, %v1296_v19 }
 0xc27   :  { %3252 = vtanh.f32 %v1299_v21  ;;  %v2580_v29 = vmul.f32 -1.442695, %v1299_v21 }
 0xc2a   :  { %v1466_v24 = vpop.f32.mrb[14].mxu1 }
 0xc2b   :  { %v1470_v25 = vadd.f32 %v1466_v24, %v196_v22  ;;  %v2909_v26 = vpop.f32.mrb[15].mxu1 }
 0xc2d   :  { %3254 = vtanh.f32 %v1470_v25  ;;  %v2583_v30 = vmul.f32 -1.442695, %v1470_v25 }
 0xc2e   :  { %3256 = vpow2.f32 %v2580_v29 }
 0xc2f   :  { %3258 = vpow2.f32 %v2583_v30 }
 0xc31   :  { %v3253_v27 = vpop.eup %3252 }
 0xc32   :  { %1309 = vrot.lane.b32.xlu0 %v3253_v27, %s3405_s18 }
 0xc37   :  { %v3255_v28 = vpop.eup %3254 }
 0xc38   :  { %1480 = vrot.lane.b32.xlu1 %v3255_v28, %s3405_s18  ;;  %v3257_v31 = vpop.eup %3256 }
 0xc39   :  { %v1303_v32 = vadd.f32 1.0, %v3257_v31  ;;  %v3259_v33 = vpop.eup %3258 }
 0xc3a   :  { %v1474_v34 = vadd.f32 1.0, %v3259_v33 }
 0xc3b   :  { %3260 = vrcp.f32 %v1303_v32 }
 0xc3c   :  { %3262 = vrcp.f32 %v1474_v34 }
 0xc45   :  { %v3261_v56 = vpop.eup %3260 }
 0xc46   :  { %v3263_v38 = vpop.eup %3262  ;;  %v1307_v40 = vmul.f32 %v3261_v56, %v3737_v63 }
 0xc47   :  { %v1478_v44 = vmul.f32 %v3263_v38, %v3741_v4 }
 0xca4   :  { %v1310_v35 = vpop.permute.xlu0 %1309 }
 0xca5   :  { %v1312_v36 = vmul.f32 %v3261_v56, %v1310_v35 }
 0xca7   :  { %1314 = vrot.lane.b32.xlu0 %v1312_v36, %s3406_s3 }
 0xcaa   :  { %v1481_v37 = vpop.permute.xlu1 %1480 }
 0xcab   :  { %v1483_v39 = vmul.f32 %v3263_v38, %v1481_v37 }
 0xcad   :  { %1485 = vrot.lane.b32.xlu1 %v1483_v39, %s3406_s3 }
 0xd19   :  { %v1315_v42 = vpop.permute.xlu0 %1314 }
 0xd1a   :  { %v3777_v43 = vadd.f32 %v1315_v42, %v1307_v40 }
 0xd1c   :  { %3264 = vtanh.f32 %v3777_v43 }
 0xd1f   :  { %v1486_v45 = vpop.permute.xlu1 %1485 }
 0xd20   :  { %v3781_v46 = vadd.f32 %v1486_v45, %v1478_v44 }
 0xd22   :  { %3266 = vtanh.f32 %v3781_v46 }
 0xd26   :  { %v3265_v48 = vpop.eup %3264 }
 0xd27   :  { %1320 = vrot.lane.b32.xlu0 %v3265_v48, %s3405_s18 }
 0xd2c   :  { %v3267_v53 = vpop.eup %3266 }
 0xd2d   :  { %1491 = vrot.lane.b32.xlu1 %v3267_v53, %s3405_s18 }
 0xd99   :  { %v1321_v49 = vpop.permute.xlu0 %1320 }
 0xd9a   :  { %v1323_v50 = vmul.f32 %v3261_v56, %v1321_v49 }
 0xd9c   :  { %1326 = vrot.lane.b32.xlu0 %v1323_v50, %s3406_s3 }
 0xd9f   :  { %v1492_v51 = vpop.permute.xlu1 %1491 }
 0xda0   :  { %v1494_v52 = vmul.f32 %v3263_v38, %v1492_v51 }
 0xda2   :  { %1496 = vrot.lane.b32.xlu1 %v1494_v52, %s3406_s3 }
 0xe0e   :  { %v1327_v59 = vpop.permute.xlu0 %1326 }
 0xe0f   :  { %2897 = vmatmul.mubr.msk.f32.vlgmr.msra.gmra.mrb[18].mxu0 %vm242_vm2, %v1327_v59 }
 0xe10   :  { %3121 = vmatpush3.bf16.msra.mxu0 %v3579_v41  ;;  %2918 = vmatprep.mubr.msk.f32.mxu0 %vm3403_vm0, %v3404_v1 }
 0xe11   :  { %3122 = vmatprep.subr.bf16.mxu0 %v3402_v0 }
 0xe14   :  { %3124 = vmatpush3.bf16.msra.mxu0 %v3600_v47  ;;  %v1497_v61 = vpop.permute.xlu1 %1496 }
 0xe15   :  { %3131 = vmatprep.subr.bf16.mxu0 %v3402_v0 }
 0xe17   :  { %2919 = vmatmul.mubr.msk.f32.vlgmr.msra.gmra.mrb[20].mxu0 %vm242_vm2, %v1497_v61 }
 0xe18   :  { %3133 = vmatpush3.bf16.msra.mxu0 %v3529_v15  ;;  %2940 = vmatprep.mubr.msk.f32.mxu0 %vm3403_vm0, %v3404_v1 }
 0xe19   :  { %3134 = vmatprep.subr.bf16.mxu0 %v3402_v0 }
 0xe1c   :  { %3136 = vmatpush3.bf16.msra.mxu0 %v3541_v18 }
 0xe1d   :  { %3143 = vmatprep.subr.bf16.mxu0 %v3402_v0 }
 0xe1f   :  { %2941 = vmatmul.mubr.msk.f32.vlgmr.msra.gmra.mrb[22].mxu0 %vm242_vm2, %v1497_v61 }
 0xe20   :  { %3145 = vmatpush3.bf16.msra.mxu0 %v3505_v5  ;;  %2962 = vmatprep.mubr.msk.f32.mxu0 %vm3403_vm0, %v3404_v1 }
 0xe21   :  { %3146 = vmatprep.subr.bf16.mxu0 %v3402_v0 }
 0xe24   :  { %3148 = vmatpush3.bf16.msra.mxu0 %v3514_v11 }
 0xe25   :  { %3155 = vmatprep.subr.bf16.mxu0 %v3402_v0 }
 0xee2   :  { %v1396_v62 = vpop.f32.mrb[18].mxu0 }
 0xee3   :  { %v2898_v63 = vpop.f32.mrb[19].mxu0 }
 0xeea   :  { %v1566_v2 = vpop.f32.mrb[20].mxu0 }
 0xeeb   :  { %v1567_v3 = vadd.f32 %v1566_v2, %v1396_v62  ;;  %v2920_v4 = vpop.f32.mrb[21].mxu0 }
 0xeed   :  { %v1570_v54 = vadd.f32 %v3647_v60, %v1567_v3 }
 0xeef   :  { %3268 = vtanh.f32 %v1570_v54  ;;  %v2585_v13 = vmul.f32 -1.442695, %v1570_v54 }
 0xef2   :  { %v1737_v7 = vpop.f32.mrb[22].mxu0 }
 0xef3   :  { %v1741_v8 = vadd.f32 %v1737_v7, %v201_v6  ;;  %v2942_v9 = vpop.f32.mrb[23].mxu0 }
 0xef5   :  { %3270 = vtanh.f32 %v1741_v8  ;;  %v2588_v14 = vmul.f32 -1.442695, %v1741_v8 }
 0xef6   :  { %3272 = vpow2.f32 %v2585_v13 }
 0xef7   :  { %3274 = vpow2.f32 %v2588_v14 }
 0xef9   :  { %v3269_v10 = vpop.eup %3268 }
 0xefa   :  { %1580 = vrot.lane.b32.xlu0 %v3269_v10, %s3405_s18 }
 0xeff   :  { %v3271_v12 = vpop.eup %3270 }
 0xf00   :  { %1751 = vrot.lane.b32.xlu1 %v3271_v12, %s3405_s18  ;;  %v3273_v16 = vpop.eup %3272 }
 0xf01   :  { %v1574_v17 = vadd.f32 1.0, %v3273_v16  ;;  %v3275_v19 = vpop.eup %3274 }
 0xf02   :  { %v1745_v20 = vadd.f32 1.0, %v3275_v19 }
 0xf03   :  { %3276 = vrcp.f32 %v1574_v17 }
 0xf04   :  { %3278 = vrcp.f32 %v1745_v20 }
 0xf0d   :  { %v3277_v55 = vpop.eup %3276 }
 0xf0e   :  { %v3279_v24 = vpop.eup %3278  ;;  %v1578_v27 = vmul.f32 %v3277_v55, %v3777_v43 }
 0xf0f   :  { %v1749_v30 = vmul.f32 %v3279_v24, %v3781_v46 }
 0xf6c   :  { %v1581_v21 = vpop.permute.xlu0 %1580 }
 0xf6d   :  { %v1583_v22 = vmul.f32 %v3277_v55, %v1581_v21 }
 0xf6f   :  { %1585 = vrot.lane.b32.xlu0 %v1583_v22, %s3406_s3 }
 0xf72   :  { %v1752_v25 = vpop.permute.xlu1 %1751 }
 0xf73   :  { %v1754_v26 = vmul.f32 %v3279_v24, %v1752_v25 }
 0xf75   :  { %1756 = vrot.lane.b32.xlu1 %v1754_v26, %s3406_s3 }
 0xfe1   :  { %v1586_v28 = vpop.permute.xlu0 %1585 }
 0xfe2   :  { %v3817_v29 = vadd.f32 %v1586_v28, %v1578_v27 }
 0xfe4   :  { %3280 = vtanh.f32 %v3817_v29 }
 0xfe7   :  { %v1757_v31 = vpop.permute.xlu1 %1756 }
 0xfe8   :  { %v3821_v32 = vadd.f32 %v1757_v31, %v1749_v30 }
 0xfea   :  { %3282 = vtanh.f32 %v3821_v32 }
 0xfee   :  { %v3281_v33 = vpop.eup %3280 }
 0xfef   :  { %1591 = vrot.lane.b32.xlu0 %v3281_v33, %s3405_s18 }
 0xff4   :  { %v3283_v34 = vpop.eup %3282 }
 0xff5   :  { %1762 = vrot.lane.b32.xlu1 %v3283_v34, %s3405_s18 }
0x1061   :  { %v1592_v56 = vpop.permute.xlu0 %1591 }
0x1062   :  { %v1594_v35 = vmul.f32 %v3277_v55, %v1592_v56 }
0x1064   :  { %1597 = vrot.lane.b32.xlu0 %v1594_v35, %s3406_s3 }
0x1067   :  { %v1763_v36 = vpop.permute.xlu1 %1762 }
0x1068   :  { %v1765_v38 = vmul.f32 %v3279_v24, %v1763_v36 }
0x106a   :  { %1767 = vrot.lane.b32.xlu1 %v1765_v38, %s3406_s3 }
0x10d6   :  { %v1598_v37 = vpop.permute.xlu0 %1597 }
0x10d7   :  { %2930 = vmatmul.mubr.msk.f32.vlgmr.msra.gmra.mrb[16].mxu1 %vm242_vm2, %v1598_v37 }
0x10d8   :  { %3139 = vmatpush3.bf16.msra.mxu1 %v3579_v41  ;;  %2951 = vmatprep.mubr.msk.f32.mxu1 %vm3403_vm0, %v3404_v1 }
0x10d9   :  { %3140 = vmatprep.subr.bf16.mxu1 %v3402_v0 }
0x10dc   :  { %3142 = vmatpush3.bf16.msra.mxu1 %v3600_v47  ;;  %v1768_v39 = vpop.permute.xlu1 %1767 }
0x10dd   :  { %3149 = vmatprep.subr.bf16.mxu1 %v3402_v0 }
0x10df   :  { %2952 = vmatmul.mubr.msk.f32.vlgmr.msra.gmra.mrb[18].mxu1 %vm242_vm2, %v1768_v39 }
0x10e0   :  { %3151 = vmatpush3.bf16.msra.mxu1 %v3529_v15  ;;  %2973 = vmatprep.mubr.msk.f32.mxu1 %vm3403_vm0, %v3404_v1 }
0x10e1   :  { %3152 = vmatprep.subr.bf16.mxu1 %v3402_v0 }
0x10e4   :  { %3154 = vmatpush3.bf16.msra.mxu1 %v3541_v18 }
0x10e5   :  { %3161 = vmatprep.subr.bf16.mxu1 %v3402_v0 }
0x10e7   :  { %2974 = vmatmul.mubr.msk.f32.vlgmr.msra.gmra.mrb[20].mxu1 %vm242_vm2, %v1768_v39 }
0x10e8   :  { %3163 = vmatpush3.bf16.msra.mxu1 %v3505_v5  ;;  %2995 = vmatprep.mubr.msk.f32.mxu1 %vm3403_vm0, %v3404_v1  ;;  %v206_v5 = vadd.f32 %v3562_v23, %v3628_v58 }
0x10e9   :  { %3164 = vmatprep.subr.bf16.mxu1 %v3402_v0 }
0x10ec   :  { %3166 = vmatpush3.bf16.msra.mxu1 %v3514_v11 }
0x10ed   :  { %3173 = vmatprep.subr.bf16.mxu1 %v3402_v0 }
0x11aa   :  { %v1667_v40 = vpop.f32.mrb[16].mxu1 }
0x11ab   :  { %v2931_v42 = vpop.f32.mrb[17].mxu1 }
0x11b2   :  { %v1837_v43 = vpop.f32.mrb[18].mxu1 }
0x11b3   :  { %v1838_v44 = vadd.f32 %v1837_v43, %v1667_v40  ;;  %v2953_v45 = vpop.f32.mrb[19].mxu1 }
0x11b5   :  { %v1841_v46 = vadd.f32 %v3647_v60, %v1838_v44 }
0x11b7   :  { %3284 = vtanh.f32 %v1841_v46  ;;  %v2590_v51 = vmul.f32 -1.442695, %v1841_v46 }
0x11ba   :  { %v2008_v48 = vpop.f32.mrb[20].mxu1 }
0x11bb   :  { %v2012_v53 = vadd.f32 %v2008_v48, %v206_v5  ;;  %v2975_v49 = vpop.f32.mrb[21].mxu1 }
0x11bd   :  { %3286 = vtanh.f32 %v2012_v53  ;;  %v2593_v52 = vmul.f32 -1.442695, %v2012_v53 }
0x11be   :  { %3288 = vpow2.f32 %v2590_v51 }
0x11bf   :  { %3290 = vpow2.f32 %v2593_v52 }
0x11c1   :  { %v3285_v50 = vpop.eup %3284 }
0x11c2   :  { %1851 = vrot.lane.b32.xlu0 %v3285_v50, %s3405_s18 }
0x11c7   :  { %v3287_v11 = vpop.eup %3286 }
0x11c8   :  { %2022 = vrot.lane.b32.xlu1 %v3287_v11, %s3405_s18  ;;  %v3289_v59 = vpop.eup %3288 }
0x11c9   :  { %v1845_v61 = vadd.f32 1.0, %v3289_v59  ;;  %v3291_v62 = vpop.eup %3290 }
0x11ca   :  { %v2016_v63 = vadd.f32 1.0, %v3291_v62 }
0x11cb   :  { %3292 = vrcp.f32 %v1845_v61 }
0x11cc   :  { %3294 = vrcp.f32 %v2016_v63 }
0x11d5   :  { %v3293_v58 = vpop.eup %3292 }
0x11d6   :  { %v3295_v4 = vpop.eup %3294  ;;  %v1849_v7 = vmul.f32 %v3293_v58, %v3817_v29  ;;  %v211_v29 = vadd.f32 %v3626_v57, %v3562_v23 }
0x11d7   :  { %v2020_v10 = vmul.f32 %v3295_v4, %v3821_v32 }
0x1234   :  { %v1852_v2 = vpop.permute.xlu0 %1851 }
0x1235   :  { %v1854_v3 = vmul.f32 %v3293_v58, %v1852_v2 }
0x1237   :  { %1856 = vrot.lane.b32.xlu0 %v1854_v3, %s3406_s3 }
0x123a   :  { %v2023_v54 = vpop.permute.xlu1 %2022 }
0x123b   :  { %v2025_v6 = vmul.f32 %v3295_v4, %v2023_v54 }
0x123d   :  { %2027 = vrot.lane.b32.xlu1 %v2025_v6, %s3406_s3 }
0x12a9   :  { %v1857_v8 = vpop.permute.xlu0 %1856 }
0x12aa   :  { %v3857_v9 = vadd.f32 %v1857_v8, %v1849_v7 }
0x12ac   :  { %3296 = vtanh.f32 %v3857_v9 }
0x12af   :  { %v2028_v12 = vpop.permute.xlu1 %2027 }
0x12b0   :  { %v3861_v13 = vadd.f32 %v2028_v12, %v2020_v10 }
0x12b2   :  { %3298 = vtanh.f32 %v3861_v13 }
0x12b6   :  { %v3297_v14 = vpop.eup %3296 }
0x12b7   :  { %1862 = vrot.lane.b32.xlu0 %v3297_v14, %s3405_s18 }
0x12bc   :  { %v3299_v16 = vpop.eup %3298 }
0x12bd   :  { %2033 = vrot.lane.b32.xlu1 %v3299_v16, %s3405_s18 }
0x1329   :  { %v1863_v17 = vpop.permute.xlu0 %1862 }
0x132a   :  { %v1865_v19 = vmul.f32 %v3293_v58, %v1863_v17 }
0x132c   :  { %1868 = vrot.lane.b32.xlu0 %v1865_v19, %s3406_s3 }
0x132f   :  { %v2034_v20 = vpop.permute.xlu1 %2033 }
0x1330   :  { %v2036_v55 = vmul.f32 %v3295_v4, %v2034_v20  ;;  %v2601_v20 = vld [vmem:[%s3944_s7] ss:$0 sm:$0xff] }
0x1332   :  { %2038 = vrot.lane.b32.xlu1 %v2036_v55, %s3406_s3 }
0x139e   :  { %v1869_v21 = vpop.permute.xlu0 %1868 }
0x139f   :  { %2963 = vmatmul.mubr.msk.f32.vlgmr.msra.gmra.mrb[24].mxu0 %vm242_vm2, %v1869_v21 }
0x13a0   :  { %3157 = vmatpush3.bf16.msra.mxu0 %v3579_v41  ;;  %2984 = vmatprep.mubr.msk.f32.mxu0 %vm3403_vm0, %v3404_v1 }
0x13a1   :  { %3158 = vmatprep.subr.bf16.mxu0 %v3402_v0 }
0x13a4   :  { %3160 = vmatpush3.bf16.msra.mxu0 %v3600_v47  ;;  %v2039_v22 = vpop.permute.xlu1 %2038 }
0x13a5   :  { %3167 = vmatprep.subr.bf16.mxu0 %v3402_v0 }
0x13a7   :  { %2985 = vmatmul.mubr.msk.f32.vlgmr.msra.gmra.mrb[26].mxu0 %vm242_vm2, %v2039_v22 }
0x13a8   :  { %3169 = vmatpush3.bf16.msra.mxu0 %v3529_v15  ;;  %3006 = vmatprep.mubr.msk.f32.mxu0 %vm3403_vm0, %v3404_v1 }
0x13a9   :  { %3170 = vmatprep.subr.bf16.mxu0 %v3402_v0 }
0x13ac   :  { %3172 = vmatpush3.bf16.msra.mxu0 %v3541_v18 }
0x13ad   :  { %3179 = vmatprep.subr.bf16.mxu0 %v3402_v0 }
0x13af   :  { %3007 = vmatmul.mubr.msk.f32.vlgmr.msra.gmra.mrb[28].mxu0 %vm242_vm2, %v2039_v22 }
0x13b0   :  { %3028 = vmatprep.mubr.msk.f32.mxu0 %vm3403_vm0, %v3404_v1 }
0x1472   :  { %v1938_v24 = vpop.f32.mrb[24].mxu0 }
0x1473   :  { %v2964_v25 = vpop.f32.mrb[25].mxu0 }
0x147a   :  { %v2108_v26 = vpop.f32.mrb[26].mxu0 }
0x147b   :  { %v2109_v27 = vadd.f32 %v2108_v26, %v1938_v24  ;;  %v2986_v28 = vpop.f32.mrb[27].mxu0 }
0x147c   :  { %v2450_v28 = vld [vmem:[#allocation6] sm:$0xff] }
0x147d   :  { %v2112_v15 = vadd.f32 %v3647_v60, %v2109_v27  ;;  %v2602_v27 = vld [vmem:[%s3945_s8] ss:$0 sm:$0xff] }
0x147f   :  { %3300 = vtanh.f32 %v2112_v15  ;;  %v2595_v34 = vmul.f32 -1.442695, %v2112_v15  ;;  %v2451_v15 = vld [vmem:[#allocation6 + $0x8] sm:$0xff] }
0x1482   :  { %v2279_v30 = vpop.f32.mrb[28].mxu0 }
0x1483   :  { %v2283_v18 = vadd.f32 %v2279_v30, %v211_v29  ;;  %v3008_v31 = vpop.f32.mrb[29].mxu0  ;;  %v2452_v29 = vld [vmem:[#allocation6 + $0x10] sm:$0xff]  ;;  %v3180_v30 = vpack.c.bf16 %v2451_v15, %v2450_v28 }
0x1485   :  { %3302 = vtanh.f32 %v2283_v18  ;;  %v2598_v56 = vmul.f32 -1.442695, %v2283_v18  ;;  %v2453_v18 = vld [vmem:[#allocation6 + $0x18] sm:$0xff]  ;;  %3181 = vmatpush3.bf16.msra.mxu0 %v3180_v30 }
0x1486   :  { %3304 = vpow2.f32 %v2595_v34  ;;  %v3183_v31 = vpack.c.bf16 %v2453_v18, %v2452_v29  ;;  %3182 = vmatprep.subr.bf16.mxu0 %v3402_v0 }
0x1487   :  { %3306 = vpow2.f32 %v2598_v56 }
0x1489   :  { %v3301_v32 = vpop.eup %3300  ;;  %3184 = vmatpush3.bf16.msra.mxu0 %v3183_v31 }
0x148a   :  { %2122 = vrot.lane.b32.xlu0 %v3301_v32, %s3405_s18 }
0x148f   :  { %v3303_v33 = vpop.eup %3302 }
0x1490   :  { %2293 = vrot.lane.b32.xlu1 %v3303_v33, %s3405_s18  ;;  %v3305_v35 = vpop.eup %3304 }
0x1491   :  { %v2116_v36 = vadd.f32 1.0, %v3305_v35  ;;  %v3307_v38 = vpop.eup %3306 }
0x1492   :  { %v2287_v37 = vadd.f32 1.0, %v3307_v38 }
0x1493   :  { %3308 = vrcp.f32 %v2116_v36 }
0x1494   :  { %3310 = vrcp.f32 %v2287_v37 }
0x149d   :  { %v3309_v23 = vpop.eup %3308 }
0x149e   :  { %v3311_v40 = vpop.eup %3310  ;;  %v2120_v44 = vmul.f32 %v3309_v23, %v3857_v9 }
0x149f   :  { %v2291_v5 = vmul.f32 %v3311_v40, %v3861_v13 }
0x14fc   :  { %v2123_v57 = vpop.permute.xlu0 %2122 }
0x14fd   :  { %v2125_v39 = vmul.f32 %v3309_v23, %v2123_v57 }
0x14ff   :  { %2127 = vrot.lane.b32.xlu0 %v2125_v39, %s3406_s3 }
0x1502   :  { %v2294_v42 = vpop.permute.xlu1 %2293 }
0x1503   :  { %v2296_v43 = vmul.f32 %v3311_v40, %v2294_v42 }
0x1505   :  { %2298 = vrot.lane.b32.xlu1 %v2296_v43, %s3406_s3 }
0x1571   :  { %v2128_v45 = vpop.permute.xlu0 %2127 }
0x1572   :  { %v2130_v46 = vadd.f32 %v2128_v45, %v2120_v44 }
0x1574   :  { %3312 = vtanh.f32 %v2130_v46 }
0x1577   :  { %v2299_v48 = vpop.permute.xlu1 %2298 }
0x1578   :  { %v2301_v53 = vadd.f32 %v2299_v48, %v2291_v5 }
0x157a   :  { %3314 = vtanh.f32 %v2301_v53 }
0x157e   :  { %v3313_v49 = vpop.eup %3312 }
0x157f   :  { %2133 = vrot.lane.b32.xlu0 %v3313_v49, %s3405_s18 }
0x1584   :  { %v3315_v50 = vpop.eup %3314 }
0x1585   :  { %2304 = vrot.lane.b32.xlu1 %v3315_v50, %s3405_s18 }
0x15f1   :  { %v2134_v11 = vpop.permute.xlu0 %2133 }
0x15f2   :  { %v2136_v51 = vmul.f32 %v3309_v23, %v2134_v11 }
0x15f4   :  { %2139 = vrot.lane.b32.xlu0 %v2136_v51, %s3406_s3 }
0x15f7   :  { %v2305_v52 = vpop.permute.xlu1 %2304 }
0x15f8   :  { %v2307_v59 = vmul.f32 %v3311_v40, %v2305_v52 }
0x15fa   :  { %2309 = vrot.lane.b32.xlu1 %v2307_v59, %s3406_s3 }
0x1666   :  { %v2140_v61 = vpop.permute.xlu0 %2139 }
0x1667   :  { %2996 = vmatmul.mubr.msk.f32.vlgmr.msra.gmra.mrb[22].mxu1 %vm242_vm2, %v2140_v61 }
0x1668   :  { %3175 = vmatpush3.bf16.msra.mxu1 %v3579_v41  ;;  %3017 = vmatprep.mubr.msk.f32.mxu1 %vm3403_vm0, %v3404_v1 }
0x1669   :  { %3176 = vmatprep.subr.bf16.mxu1 %v3402_v0  ;;  %v2603_v0 = vld [vmem:[%s3947_s10] ss:$0 sm:$0xff] }
0x166c   :  { %3178 = vmatpush3.bf16.msra.mxu1 %v3600_v47  ;;  %v2310_v62 = vpop.permute.xlu1 %2309 }
0x166f   :  { %3018 = vmatmul.mubr.msk.f32.vlgmr.msra.gmra.mrb[24].mxu1 %vm242_vm2, %v2310_v62 }
0x173a   :  { %v2209_v63 = vpop.f32.mrb[22].mxu1 }
0x173b   :  { %v2997_v58 = vpop.f32.mrb[23].mxu1 }
0x1742   :  { %v2379_v2 = vpop.f32.mrb[24].mxu1 }
0x1743   :  { %v2380_v3 = vadd.f32 %v2379_v2, %v2209_v63  ;;  %v3019_v4 = vpop.f32.mrb[25].mxu1 }
0x1745   :  { %v2383_v54 = vadd.f32 %v3647_v60, %v2380_v3 }
0x1747   :  { %3316 = vtanh.f32 %v2383_v54  ;;  %v2600_v41 = vmul.f32 -1.442695, %v2383_v54 }
0x1749   :  { %3318 = vpow2.f32 %v2600_v41 }
0x1751   :  { %v3317_v6 = vpop.eup %3316 }
0x1752   :  { %2393 = vrot.lane.b32.xlu0 %v3317_v6, %s3405_s18 }
0x1753   :  { %v3319_v1 = vpop.eup %3318 }
0x1754   :  { %v2387_v7 = vadd.f32 1.0, %v3319_v1 }
0x1756   :  { %3320 = vrcp.f32 %v2387_v7 }
0x1760   :  { %v3321_v47 = vpop.eup %3320 }
0x1761   :  { %v2391_v10 = vmul.f32 %v3321_v47, %v2130_v46 }
0x17c4   :  { %v2394_v8 = vpop.permute.xlu0 %2393 }
0x17c5   :  { %v2396_v9 = vmul.f32 %v3321_v47, %v2394_v8 }
0x17c7   :  { %2398 = vrot.lane.b32.xlu1 %v2396_v9, %s3406_s3 }
0x1839   :  { %v2399_v12 = vpop.permute.xlu1 %2398 }
0x183a   :  { %v2401_v13 = vadd.f32 %v2399_v12, %v2391_v10 }
0x183c   :  { %3322 = vtanh.f32 %v2401_v13 }
0x1846   :  { %v3323_v14 = vpop.eup %3322 }
0x1847   :  { %2404 = vrot.lane.b32.xlu0 %v3323_v14, %s3405_s18 }
0x18b9   :  { %v2405_v60 = vpop.permute.xlu0 %2404 }
0x18ba   :  { %v2407_v16 = vmul.f32 %v3321_v47, %v2405_v60 }
0x18bc   :  { %2411 = vrot.lane.b32.xlu1 %v2407_v16, %s3406_s3 }
0x192e   :  { %v2412_v17 = vpop.permute.xlu1 %2411 }
0x192f   :  { %v2414_v19 = vsel %vm242_vm2, %v2412_v17, 0.0 }
0x1930   :  { %2415 = vadd.xlane.f32.xlu0 %v2414_v19 }
0x1946   :  { %2437 = vrot.lane.b32.xlu0 %v2601_v20, %s3407_s1 }
0x19bd   :  { %v2416_v55 = vpop.xlane.xlu0 %2415 }
0x19be   :  { %v2418_v21 = vmul.f32 0.03125, %v2416_v55 }
0x19c0   :  { %v2419_v22 = vsub.f32 %v2407_v16, %v2418_v21 }
0x19c1   :  { %v2438_v35 = vpop.permute.xlu0 %2437 }
0x19c2   :  { %v2420_v24 = vmul.f32 %v2419_v22, %v2419_v22 }
0x19c4   :  { %2422 = vrot.lane.b32.xlu1 %v2420_v24, %s3406_s3 }
0x1a36   :  { %v2423_v25 = vpop.permute.xlu1 %2422 }
0x1a37   :  { %v2425_v26 = vsel %vm242_vm2, %v2423_v25, 0.0 }
0x1a38   :  { %2426 = vadd.xlane.f32.xlu1 %v2425_v26 }
0x1a49   :  { %2446 = vrot.lane.b32.xlu1 %v2602_v27, %s3407_s1 }
0x1ac5   :  { %v2427_v32 = vpop.xlane.xlu1 %2426 }
0x1ac6   :  { %v2428_v33 = vmul.f32 0.03125, %v2427_v32 }
0x1ac8   :  { %v2429_v34 = vadd.f32 1e-05, %v2428_v33 }
0x1ac9   :  { %v2447_v38 = vpop.permute.xlu1 %2446 }
0x1aca   :  { %3324 = vrsqrt.f32 %v2429_v34 }
0x1ad4   :  { %v3325_v56 = vpop.eup %3324 }
0x1ad5   :  { %v2431_v36 = vmul.f32 %v3325_v56, %v2419_v22 }
0x1ad7   :  { %v2440_v37 = vmul.f32 %v2438_v35, %v2431_v36 }
0x1ad9   :  { %v2449_v23 = vadd.f32 %v2447_v38, %v2440_v37 }
0x1adb   :  { %2462 = vrot.lane.b32.xlu0 %v2449_v23, %s3406_s3 }
0x1b4d   :  { %v2463_v57 = vpop.permute.xlu0 %2462 }
0x1b4e   :  { %3029 = vmatmul.mubr.msk.f32.vlgmr.msra.gmra.mrb[30].mxu0 %vm242_vm2, %v2463_v57 }
0x1c21   :  { %v2532_v39 = vpop.f32.mrb[30].mxu0 }
0x1c22   :  { %v2533_v40 = vadd.f32 %v2603_v0, %v2532_v39  ;;  %v3030_v42 = vpop.f32.mrb[31].mxu0 }
0x1c24   :  { %2536 = vst [vmem:[#allocation8] sm:$0xff] %v2533_v40 }
0x1c25   :  { %3381 = shalt.err (!%p3378_p6)
}
0x1c26   :  { %s3382_s27 = scalar_lea.hbm %s3948_s11, 128 }
0x1c27   :  { %p3383_p7 = scmp.ne.s32.totalorder %s3948_s11, %s3382_s27  ;;  %p3386_p8 = scmp.lt.u32.totalorder %s3382_s27, %s3948_s11 }
0x1c29   :  { %p3388_p9 = pnand %p3386_p8, %p3383_p7 }
0x1c2b   :  { %3391 = shalt.err (!%p3388_p9)
}
0x1c2c   :  { %2546 = dma.vmem_to_hbm [thread:$0]  %s2544_s25, 128, %s3948_s11, [#allocation5]  }
0x1c2d   :  { %3396 = dma.done.wait [#allocation5], 128  }
0x1c2e   :  { %3397 = vsyncadd [#allocation5], 4294967168 }
0x1c2f   :  { %2550 = vsyncpa [#allocation4], 1 }
0x1c30   :  { %2551 = vsyncpa [#allocation7], 1 }
0x1c31   :  { %2552 = vsyncpa [#allocation5], 1 }

</bundles_post_ra>
